<compile_context>
chip_gen: v7x
topology: tpu7x:2x2x1
jax: 0.10.0
libtpu: 0.0.40
codegen_flags: <defaults>
</compile_context>

<pallas_src>
import jax
import jax.numpy as jnp
from jax.experimental import pallas as pl
from jax.experimental.pallas import tpu as pltpu

SEG = 128  # TPU lane width; every packed segment is SEG lanes wide.


def _round_up(x, m):
    return ((x + m - 1) // m) * m


# --------------------------------------------------------------------------
# Kernel
# --------------------------------------------------------------------------
def gmvae_fused_kernel(
    x_ref, eps_ref,
    w1_ref, b1_ref,        # fused first layer:  (v_dim, 4*hidden=128), (1, 128)
    w2_ref, b2_ref,        # fused block-diag second layer: (128, 4*SEG), (1, 4*SEG)
    pcw1w_ref, pcw1h_ref,  # Pc_wh first layer split, padded: (SEG, SEG) each
    pcb1_ref, pcw2_ref, pcb2_ref,   # (1, SEG), (SEG, SEG), (1, SEG)
    out_ref,               # lane-dense output slab: (tb, 3*SEG) = [h|pad][w|pad][c|pad]
):
    x = x_ref[...]  # (tb, v_dim) f32

    # ---- fused first layer (all four inference heads in one MXU pass) ----
    hid1 = jnp.dot(x, w1_ref[...], preferred_element_type=jnp.float32) + b1_ref[...]
    hid1 = jnp.maximum(hid1, 0.0)                       # ReLU, (tb, 128)

    # ---- fused block-diagonal second layer ----
    # Each stat occupies its own lane-aligned 128-wide segment; pad lanes are 0.
    stats = jnp.dot(hid1, w2_ref[...], preferred_element_type=jnp.float32) + b2_ref[...]

    h_mean   = stats[:, 0 * SEG:1 * SEG]
    h_logstd = stats[:, 1 * SEG:2 * SEG]
    w_mean   = stats[:, 2 * SEG:3 * SEG]
    w_logstd = stats[:, 3 * SEG:4 * SEG]

    eps = eps_ref[...]                                  # (tb, 2*SEG)
    eps_h = eps[:, 0 * SEG:1 * SEG]
    eps_w = eps[:, 1 * SEG:2 * SEG]

    # Reparameterization exactly as in the PyTorch module: mean + eps * exp(2*logstd).
    # Pad lanes of mean / logstd / eps are all zero -> pad lanes of samples stay 0.
    h_sample = h_mean + eps_h * jnp.exp(h_logstd * 2.0)   # (tb, 128)
    w_sample = w_mean + eps_w * jnp.exp(w_logstd * 2.0)   # (tb, 128)

    # ---- GenerationNet.infer_c : Pc_wh(cat([w_sample, h_sample])) ----
    # Concatenate eliminated: split weight, sum two partial matmuls.
    hid_c = (
        jnp.dot(w_sample, pcw1w_ref[...], preferred_element_type=jnp.float32)
        + jnp.dot(h_sample, pcw1h_ref[...], preferred_element_type=jnp.float32)
        + pcb1_ref[...]
    )
    hid_c = jnp.maximum(hid_c, 0.0)                     # (tb, 128)
    # Pad logit lanes carry -1e30 via pc_b2 padding -> exp underflows to exactly 0,
    # so the 128-lane softmax equals the n_classes softmax.
    logits = jnp.dot(hid_c, pcw2_ref[...], preferred_element_type=jnp.float32) + pcb2_ref[...]

    m = jnp.max(logits, axis=-1, keepdims=True)
    e = jnp.exp(logits - m)
    denom = jnp.sum(e, axis=-1, keepdims=True)
    prob_c = e / denom   # exact normalization: one scalar per row, negligible cost

    # ---- three aligned full-vreg stores into the lane-dense output slab ----
    # No zero-init: every stored segment is full 128 lanes wide; the wrapper only
    # reads the valid leading columns of each segment.
    out_ref[:, 0 * SEG:1 * SEG] = h_sample
    out_ref[:, 1 * SEG:2 * SEG] = w_sample
    out_ref[:, 2 * SEG:3 * SEG] = prob_c


# --------------------------------------------------------------------------
# Host-side parameter packing
# --------------------------------------------------------------------------
def init_linear(key, in_dim, out_dim):
    """PyTorch-style Linear init (uniform +- 1/sqrt(in_dim)), weight as (in, out)."""
    k1, k2 = jax.random.split(key)
    bound = 1.0 / jnp.sqrt(jnp.float32(in_dim))
    w = jax.random.uniform(k1, (in_dim, out_dim), jnp.float32, -bound, bound)
    b = jax.random.uniform(k2, (1, out_dim), jnp.float32, -bound, bound)
    return w, b


def init_mlp(key, in_dim, hidden_dim, out_dim):
    k1, k2 = jax.random.split(key)
    w1, b1 = init_linear(k1, in_dim, hidden_dim)
    w2, b2 = init_linear(k2, hidden_dim, out_dim)
    return (w1, b1, w2, b2)


def pack_gmvae_params(params):
    """Collapse the 20 Linear tensors into 9 lane-aligned MXU/DMA-friendly arrays."""
    qhm, qhv, qwm, qwv, pc = params
    hidden = qhm[0].shape[1]
    h_dim = qhm[2].shape[1]
    w_dim = qwm[2].shape[1]
    n_classes = pc[2].shape[1]

    assert 4 * hidden == SEG, "module fixes hidden_dim=32 -> 4*hidden must be 128"
    assert max(h_dim, w_dim, n_classes, hidden) <= SEG

    # Fused first layer: (v_dim, 4*hidden) + (1, 4*hidden)
    w1_all = jnp.concatenate([qhm[0], qhv[0], qwm[0], qwv[0]], axis=1)
    b1_all = jnp.concatenate([qhm[1], qhv[1], qwm[1], qwv[1]], axis=1)

    # Fused block-diagonal second layer, each stat in its own lane-aligned
    # 128-wide segment: [h_mean|pad][h_logstd|pad][w_mean|pad][w_logstd|pad]
    w2_all = jnp.zeros((4 * hidden, 4 * SEG), jnp.float32)
    b2_all = jnp.zeros((1, 4 * SEG), jnp.float32)
    for i, blk in enumerate((qhm, qhv, qwm, qwv)):
        w2, b2 = blk[2], blk[3]
        out_d = w2.shape[1]
        w2_all = w2_all.at[i * hidden:(i + 1) * hidden, i * SEG:i * SEG + out_d].set(w2)
        b2_all = b2_all.at[:, i * SEG:i * SEG + out_d].set(b2)

    # Pc_wh head, padded to 128 lanes everywhere. torch.cat order is [w, h].
    pc_w1, pc_b1, pc_w2, pc_b2 = pc
    pc_w1_w = jnp.zeros((SEG, SEG), jnp.float32).at[:w_dim, :hidden].set(pc_w1[:w_dim, :])
    pc_w1_h = jnp.zeros((SEG, SEG), jnp.float32).at[:h_dim, :hidden].set(
        pc_w1[w_dim:w_dim + h_dim, :])
    pc_b1_p = jnp.zeros((1, SEG), jnp.float32).at[:, :hidden].set(pc_b1)
    pc_w2_p = jnp.zeros((SEG, SEG), jnp.float32).at[:hidden, :n_classes].set(pc_w2)
    # Pad logit lanes with a large finite negative (NOT -inf: inf-inf -> NaN risk)
    # so the 128-lane softmax ignores them.
    pc_b2_p = jnp.full((1, SEG), -1e30, jnp.float32).at[:, :n_classes].set(pc_b2)

    return (w1_all, b1_all, w2_all, b2_all, pc_w1_w, pc_w1_h, pc_b1_p, pc_w2_p, pc_b2_p)


# --------------------------------------------------------------------------
# Wrapper
# --------------------------------------------------------------------------
def gmvae_forward(x_nchw, params, eps_h, eps_w):
    """x_nchw: (B, C, H, W) float32. Returns dict with 'h', 'w', 'c'."""
    qhm, qhv, qwm, qwv, pc = params
    h_dim = qhm[2].shape[1]
    w_dim = qwm[2].shape[1]
    n_classes = pc[2].shape[1]

    B = x_nchw.shape[0]
    x_flat = x_nchw.reshape(B, -1).astype(jnp.float32)   # == v.view(v.shape[0], -1)
    v_dim = x_flat.shape[1]

    packed = pack_gmvae_params(params)
    (w1_all, b1_all, w2_all, b2_all,
     pc_w1_w, pc_w1_h, pc_b1_p, pc_w2_p, pc_b2_p) = packed

    # Lane-aligned packed noise: [eps_h | pad][eps_w | pad], pad lanes zero.
    eps_pack = jnp.zeros((B, 2 * SEG), jnp.float32)
    eps_pack = eps_pack.at[:, :h_dim].set(eps_h)
    eps_pack = eps_pack.at[:, SEG:SEG + w_dim].set(eps_w)

    # Batch tile: amortize the ~0.35us per-grid-step overhead with a large tile,
    # but keep >= 2 grid steps when B >= 256 so the "parallel" batch axis actually
    # splits across v7x's two TensorCores. tb <= 512 keeps the double-buffered
    # working set (~10 MiB) inside v5e's 16 MiB scoped-VMEM default.
    if B >= 256:
        tb = min(512, _round_up((B + 1) // 2, 8))
    else:
        tb = _round_up(B, 8)
    b_pad = _round_up(B, tb)
    if b_pad != B:
        x_flat = jnp.pad(x_flat, ((0, b_pad - B), (0, 0)))
        eps_pack = jnp.pad(eps_pack, ((0, b_pad - B), (0, 0)))
    grid = (b_pad // tb,)

    batch_map = lambda i: (i, 0)
    const_map = lambda i: (0, 0)

    out_pad = 3 * SEG

    in_specs = [
        pl.BlockSpec((tb, v_dim), batch_map),
        pl.BlockSpec((tb, 2 * SEG), batch_map),
        pl.BlockSpec(w1_all.shape, const_map),
        pl.BlockSpec(b1_all.shape, const_map),
        pl.BlockSpec(w2_all.shape, const_map),
        pl.BlockSpec(b2_all.shape, const_map),
        pl.BlockSpec(pc_w1_w.shape, const_map),
        pl.BlockSpec(pc_w1_h.shape, const_map),
        pl.BlockSpec(pc_b1_p.shape, const_map),
        pl.BlockSpec(pc_w2_p.shape, const_map),
        pl.BlockSpec(pc_b2_p.shape, const_map),
    ]
    out_specs = pl.BlockSpec((tb, out_pad), batch_map)

    flops = int(
        2 * b_pad * v_dim * w1_all.shape[1]             # fused first layer
        + 2 * b_pad * w2_all.shape[0] * w2_all.shape[1]  # block-diag second layer
        + 2 * b_pad * SEG * SEG * 3                      # Pc head (2 partials + logits)
    )
    transcendentals = int(b_pad * 3 * SEG)               # 2 reparam exp segs + softmax exp
    bytes_accessed = int(4 * (
        b_pad * (v_dim + 2 * SEG + out_pad)
        + sum(a.size for a in packed)
    ))

    out = pl.pallas_call(
        gmvae_fused_kernel,
        out_shape=jax.ShapeDtypeStruct((b_pad, out_pad), jnp.float32),
        grid=grid,
        in_specs=in_specs,
        out_specs=out_specs,
        compiler_params=pltpu.CompilerParams(
            dimension_semantics=("parallel",)),
        cost_estimate=pl.CostEstimate(
            flops=flops,
            transcendentals=transcendentals,
            bytes_accessed=bytes_accessed),
    )(x_flat, eps_pack, *packed)

    # Only the leading valid columns of each 128-wide segment are meaningful.
    return {
        "h": out[:B, 0:h_dim],
        "w": out[:B, SEG:SEG + w_dim],
        "c": out[:B, 2 * SEG:2 * SEG + n_classes],
    }


# --------------------------------------------------------------------------
# Pure-JAX reference (mirrors the PyTorch GMVAE.forward semantics)
# --------------------------------------------------------------------------
def gmvae_forward_ref(x_nchw, params, eps_h, eps_w):
    B = x_nchw.shape[0]
    x = x_nchw.reshape(B, -1)
    (qhm, qhv, qwm, qwv, pc) = params

    def mlp(inp, p):
        w1, b1, w2, b2 = p
        return jnp.maximum(inp @ w1 + b1, 0.0) @ w2 + b2

    h_mean, h_logstd = mlp(x, qhm), mlp(x, qhv)
    h_sample = h_mean + eps_h * jnp.exp(h_logstd * 2.0)
    w_mean, w_logstd = mlp(x, qwm), mlp(x, qwv)
    w_sample = w_mean + eps_w * jnp.exp(w_logstd * 2.0)
    logits = mlp(jnp.concatenate([w_sample, h_sample], axis=-1), pc)
    prob_c = jax.nn.softmax(logits, axis=-1)
    return {"h": h_sample, "w": w_sample, "c": prob_c}


if __name__ == "__main__":
    # Small, GMVAE-consistent shapes: X is (B, C, H, W); v_dim = C*H*W.
    B, C, H, W = 8, 4, 16, 16
    v_dim = C * H * W        # 1024
    h_dim = 32
    w_dim = 16
    n_classes = 8
    hidden_dim = 32          # fixed in the PyTorch module

    root = jax.random.PRNGKey(0)
    kx, keh, kew, k1, k2, k3, k4, k5 = jax.random.split(root, 8)

    x = jax.random.normal(kx, (B, C, H, W), jnp.float32)
    eps_h = jax.random.normal(keh, (B, h_dim), jnp.float32)   # torch.randn_like(h_mean)
    eps_w = jax.random.normal(kew, (B, w_dim), jnp.float32)   # torch.randn_like(w_mean)

    params = (
        init_mlp(k1, v_dim, hidden_dim, h_dim),              # Qh_v_mean
        init_mlp(k2, v_dim, hidden_dim, h_dim),              # Qh_v_var
        init_mlp(k3, v_dim, hidden_dim, w_dim),              # Qw_v_mean
        init_mlp(k4, v_dim, hidden_dim, w_dim),              # Qw_v_var
        init_mlp(k5, w_dim + h_dim, hidden_dim, n_classes),  # Pc_wh
    )

    out = gmvae_forward(x, params, eps_h, eps_w)
    jax.block_until_ready(out)

    ref = gmvae_forward_ref(x, params, eps_h, eps_w)
    for key in ("h", "w", "c"):
        assert out[key].shape == ref[key].shape, key
        assert jnp.allclose(out[key], ref[key], atol=1e-4, rtol=1e-4), key

    print("KERNEL_OK")
</pallas_src>

<mosaic_0001>
module attributes {stable_mosaic.version = 11 : i64} {
  func.func @gmvae_fused_kernel(%arg0: i32, %arg1: memref<8x1024xf32, #tpu.memory_space<vmem>>, %arg2: memref<8x256xf32, #tpu.memory_space<vmem>>, %arg3: memref<1024x128xf32, #tpu.memory_space<vmem>>, %arg4: memref<1x128xf32, #tpu.memory_space<vmem>>, %arg5: memref<128x512xf32, #tpu.memory_space<vmem>>, %arg6: memref<1x512xf32, #tpu.memory_space<vmem>>, %arg7: memref<128x128xf32, #tpu.memory_space<vmem>>, %arg8: memref<128x128xf32, #tpu.memory_space<vmem>>, %arg9: memref<1x128xf32, #tpu.memory_space<vmem>>, %arg10: memref<128x128xf32, #tpu.memory_space<vmem>>, %arg11: memref<1x128xf32, #tpu.memory_space<vmem>>, %arg12: memref<8x384xf32, #tpu.memory_space<vmem>>) attributes {dimension_semantics = [#tpu.dimension_semantics<parallel>], iteration_bounds = array<i64: 1>, scalar_prefetch = 0 : i64, scratch_operands = 0 : i64, tpu.core_type = #tpu.core_type<tc>, window_params = [{transform_indices = @transform_0, window_bounds = array<i64: 8, 1024>}, {transform_indices = @transform_1, window_bounds = array<i64: 8, 256>}, {pipeline_mode = #tpu.pipeline_mode<synchronous>, transform_indices = @transform_2, window_bounds = array<i64: 1024, 128>}, {pipeline_mode = #tpu.pipeline_mode<synchronous>, transform_indices = @transform_3, window_bounds = array<i64: 1, 128>}, {pipeline_mode = #tpu.pipeline_mode<synchronous>, transform_indices = @transform_4, window_bounds = array<i64: 128, 512>}, {pipeline_mode = #tpu.pipeline_mode<synchronous>, transform_indices = @transform_5, window_bounds = array<i64: 1, 512>}, {pipeline_mode = #tpu.pipeline_mode<synchronous>, transform_indices = @transform_6, window_bounds = array<i64: 128, 128>}, {pipeline_mode = #tpu.pipeline_mode<synchronous>, transform_indices = @transform_7, window_bounds = array<i64: 128, 128>}, {pipeline_mode = #tpu.pipeline_mode<synchronous>, transform_indices = @transform_8, window_bounds = array<i64: 1, 128>}, {pipeline_mode = #tpu.pipeline_mode<synchronous>, transform_indices = @transform_9, window_bounds = array<i64: 128, 128>}, {pipeline_mode = #tpu.pipeline_mode<synchronous>, transform_indices = @transform_10, window_bounds = array<i64: 1, 128>}, {transform_indices = @transform_11, window_bounds = array<i64: 8, 384>}]} {
    %c0 = arith.constant 0 : index
    %c0_0 = arith.constant 0 : index
    %0 = vector.load %arg1[%c0, %c0_0] : memref<8x1024xf32, #tpu.memory_space<vmem>>, vector<8x1024xf32>
    %c0_1 = arith.constant 0 : index
    %c0_2 = arith.constant 0 : index
    %1 = vector.load %arg3[%c0_1, %c0_2] : memref<1024x128xf32, #tpu.memory_space<vmem>>, vector<1024x128xf32>
    %cst = arith.constant dense<0.000000e+00> : vector<8x128xf32>
    %2 = tpu.matmul %0, %1, %cst {dimension_numbers = #tpu.dot_dimension_numbers<[1], [0], [0], [1], [0, 0, 1, 1], [], []>} : vector<8x1024xf32>, vector<1024x128xf32>, vector<8x128xf32> -> vector<8x128xf32>
    %c0_3 = arith.constant 0 : index
    %c0_4 = arith.constant 0 : index
    %3 = vector.load %arg4[%c0_3, %c0_4] : memref<1x128xf32, #tpu.memory_space<vmem>>, vector<1x128xf32>
    %4 = vector.broadcast %3 : vector<1x128xf32> to vector<8x128xf32>
    %5 = arith.addf %2, %4 : vector<8x128xf32>
    %cst_5 = arith.constant 0.000000e+00 : f32
    %6 = vector.broadcast %cst_5 : f32 to vector<8x128xf32>
    %7 = arith.maximumf %5, %6 : vector<8x128xf32>
    %c0_6 = arith.constant 0 : index
    %c0_7 = arith.constant 0 : index
    %8 = vector.load %arg5[%c0_6, %c0_7] : memref<128x512xf32, #tpu.memory_space<vmem>>, vector<128x512xf32>
    %cst_8 = arith.constant dense<0.000000e+00> : vector<8x512xf32>
    %9 = tpu.matmul %7, %8, %cst_8 {dimension_numbers = #tpu.dot_dimension_numbers<[1], [0], [0], [1], [0, 0, 1, 1], [], []>} : vector<8x128xf32>, vector<128x512xf32>, vector<8x512xf32> -> vector<8x512xf32>
    %c0_9 = arith.constant 0 : index
    %c0_10 = arith.constant 0 : index
    %10 = vector.load %arg6[%c0_9, %c0_10] : memref<1x512xf32, #tpu.memory_space<vmem>>, vector<1x512xf32>
    %11 = vector.broadcast %10 : vector<1x512xf32> to vector<8x512xf32>
    %12 = arith.addf %9, %11 : vector<8x512xf32>
    %13 = vector.extract_strided_slice %12 {offsets = [0, 0], sizes = [8, 128], strides = [1, 1]} : vector<8x512xf32> to vector<8x128xf32>
    %14 = vector.extract_strided_slice %12 {offsets = [0, 128], sizes = [8, 128], strides = [1, 1]} : vector<8x512xf32> to vector<8x128xf32>
    %15 = vector.extract_strided_slice %12 {offsets = [0, 256], sizes = [8, 128], strides = [1, 1]} : vector<8x512xf32> to vector<8x128xf32>
    %16 = vector.extract_strided_slice %12 {offsets = [0, 384], sizes = [8, 128], strides = [1, 1]} : vector<8x512xf32> to vector<8x128xf32>
    %c0_11 = arith.constant 0 : index
    %c0_12 = arith.constant 0 : index
    %17 = vector.load %arg2[%c0_11, %c0_12] : memref<8x256xf32, #tpu.memory_space<vmem>>, vector<8x256xf32>
    %18 = vector.extract_strided_slice %17 {offsets = [0, 0], sizes = [8, 128], strides = [1, 1]} : vector<8x256xf32> to vector<8x128xf32>
    %19 = vector.extract_strided_slice %17 {offsets = [0, 128], sizes = [8, 128], strides = [1, 1]} : vector<8x256xf32> to vector<8x128xf32>
    %cst_13 = arith.constant 2.000000e+00 : f32
    %20 = vector.broadcast %cst_13 : f32 to vector<8x128xf32>
    %21 = arith.mulf %14, %20 : vector<8x128xf32>
    %22 = math.exp %21 : vector<8x128xf32>
    %23 = arith.mulf %18, %22 : vector<8x128xf32>
    %24 = arith.addf %13, %23 : vector<8x128xf32>
    %cst_14 = arith.constant 2.000000e+00 : f32
    %25 = vector.broadcast %cst_14 : f32 to vector<8x128xf32>
    %26 = arith.mulf %16, %25 : vector<8x128xf32>
    %27 = math.exp %26 : vector<8x128xf32>
    %28 = arith.mulf %19, %27 : vector<8x128xf32>
    %29 = arith.addf %15, %28 : vector<8x128xf32>
    %c0_15 = arith.constant 0 : index
    %c0_16 = arith.constant 0 : index
    %30 = vector.load %arg7[%c0_15, %c0_16] : memref<128x128xf32, #tpu.memory_space<vmem>>, vector<128x128xf32>
    %cst_17 = arith.constant dense<0.000000e+00> : vector<8x128xf32>
    %31 = tpu.matmul %29, %30, %cst_17 {dimension_numbers = #tpu.dot_dimension_numbers<[1], [0], [0], [1], [0, 0, 1, 1], [], []>} : vector<8x128xf32>, vector<128x128xf32>, vector<8x128xf32> -> vector<8x128xf32>
    %c0_18 = arith.constant 0 : index
    %c0_19 = arith.constant 0 : index
    %32 = vector.load %arg8[%c0_18, %c0_19] : memref<128x128xf32, #tpu.memory_space<vmem>>, vector<128x128xf32>
    %cst_20 = arith.constant dense<0.000000e+00> : vector<8x128xf32>
    %33 = tpu.matmul %24, %32, %cst_20 {dimension_numbers = #tpu.dot_dimension_numbers<[1], [0], [0], [1], [0, 0, 1, 1], [], []>} : vector<8x128xf32>, vector<128x128xf32>, vector<8x128xf32> -> vector<8x128xf32>
    %34 = arith.addf %31, %33 : vector<8x128xf32>
    %c0_21 = arith.constant 0 : index
    %c0_22 = arith.constant 0 : index
    %35 = vector.load %arg9[%c0_21, %c0_22] : memref<1x128xf32, #tpu.memory_space<vmem>>, vector<1x128xf32>
    %36 = vector.broadcast %35 : vector<1x128xf32> to vector<8x128xf32>
    %37 = arith.addf %34, %36 : vector<8x128xf32>
    %cst_23 = arith.constant 0.000000e+00 : f32
    %38 = vector.broadcast %cst_23 : f32 to vector<8x128xf32>
    %39 = arith.maximumf %37, %38 : vector<8x128xf32>
    %c0_24 = arith.constant 0 : index
    %c0_25 = arith.constant 0 : index
    %40 = vector.load %arg10[%c0_24, %c0_25] : memref<128x128xf32, #tpu.memory_space<vmem>>, vector<128x128xf32>
    %cst_26 = arith.constant dense<0.000000e+00> : vector<8x128xf32>
    %41 = tpu.matmul %39, %40, %cst_26 {dimension_numbers = #tpu.dot_dimension_numbers<[1], [0], [0], [1], [0, 0, 1, 1], [], []>} : vector<8x128xf32>, vector<128x128xf32>, vector<8x128xf32> -> vector<8x128xf32>
    %c0_27 = arith.constant 0 : index
    %c0_28 = arith.constant 0 : index
    %42 = vector.load %arg11[%c0_27, %c0_28] : memref<1x128xf32, #tpu.memory_space<vmem>>, vector<1x128xf32>
    %43 = vector.broadcast %42 : vector<1x128xf32> to vector<8x128xf32>
    %44 = arith.addf %41, %43 : vector<8x128xf32>
    %cst_29 = arith.constant dense<0xFF800000> : vector<8xf32>
    %45 = vector.multi_reduction <maximumf>, %44, %cst_29 [1] : vector<8x128xf32> to vector<8xf32>
    %46 = vector.shape_cast %45 : vector<8xf32> to vector<8x1xf32>
    %47 = vector.broadcast %46 : vector<8x1xf32> to vector<8x128xf32>
    %48 = arith.subf %44, %47 : vector<8x128xf32>
    %49 = math.exp %48 : vector<8x128xf32>
    %cst_30 = arith.constant dense<0.000000e+00> : vector<8xf32>
    %50 = vector.multi_reduction <add>, %49, %cst_30 [1] : vector<8x128xf32> to vector<8xf32>
    %51 = vector.shape_cast %50 : vector<8xf32> to vector<8x1xf32>
    %52 = vector.broadcast %51 : vector<8x1xf32> to vector<8x128xf32>
    %53 = arith.divf %49, %52 : vector<8x128xf32>
    %c0_31 = arith.constant 0 : index
    %c0_32 = arith.constant 0 : index
    %54 = vector.load %arg12[%c0_31, %c0_32] : memref<8x384xf32, #tpu.memory_space<vmem>>, vector<8x128xf32>
    tpu.vector_store %arg12[%c0_31, %c0_32], %24 {strides = array<i32>} : memref<8x384xf32, #tpu.memory_space<vmem>>, vector<8x128xf32>,
    %c0_33 = arith.constant 0 : index
    %c128 = arith.constant 128 : index
    %55 = vector.load %arg12[%c0_33, %c128] : memref<8x384xf32, #tpu.memory_space<vmem>>, vector<8x128xf32>
    tpu.vector_store %arg12[%c0_33, %c128], %29 {strides = array<i32>} : memref<8x384xf32, #tpu.memory_space<vmem>>, vector<8x128xf32>,
    %c0_34 = arith.constant 0 : index
    %c256 = arith.constant 256 : index
    %56 = vector.load %arg12[%c0_34, %c256] : memref<8x384xf32, #tpu.memory_space<vmem>>, vector<8x128xf32>
    tpu.vector_store %arg12[%c0_34, %c256], %53 {strides = array<i32>} : memref<8x384xf32, #tpu.memory_space<vmem>>, vector<8x128xf32>,
    return
  }
  func.func @transform_0(%arg0: i32) -> (i32, i32) {
    %c0_i32 = arith.constant 0 : i32
    %c0_i32_0 = arith.constant 0 : i32
    return %arg0, %c0_i32 : i32, i32
  }
  func.func @transform_1(%arg0: i32) -> (i32, i32) {
    %c0_i32 = arith.constant 0 : i32
    %c0_i32_0 = arith.constant 0 : i32
    return %arg0, %c0_i32 : i32, i32
  }
  func.func @transform_2(%arg0: i32) -> (i32, i32) {
    %c0_i32 = arith.constant 0 : i32
    %c0_i32_0 = arith.constant 0 : i32
    %c0_i32_1 = arith.constant 0 : i32
    return %c0_i32, %c0_i32_0 : i32, i32
  }
  func.func @transform_3(%arg0: i32) -> (i32, i32) {
    %c0_i32 = arith.constant 0 : i32
    %c0_i32_0 = arith.constant 0 : i32
    %c0_i32_1 = arith.constant 0 : i32
    return %c0_i32, %c0_i32_0 : i32, i32
  }
  func.func @transform_4(%arg0: i32) -> (i32, i32) {
    %c0_i32 = arith.constant 0 : i32
    %c0_i32_0 = arith.constant 0 : i32
    %c0_i32_1 = arith.constant 0 : i32
    return %c0_i32, %c0_i32_0 : i32, i32
  }
  func.func @transform_5(%arg0: i32) -> (i32, i32) {
    %c0_i32 = arith.constant 0 : i32
    %c0_i32_0 = arith.constant 0 : i32
    %c0_i32_1 = arith.constant 0 : i32
    return %c0_i32, %c0_i32_0 : i32, i32
  }
  func.func @transform_6(%arg0: i32) -> (i32, i32) {
    %c0_i32 = arith.constant 0 : i32
    %c0_i32_0 = arith.constant 0 : i32
    %c0_i32_1 = arith.constant 0 : i32
    return %c0_i32, %c0_i32_0 : i32, i32
  }
  func.func @transform_7(%arg0: i32) -> (i32, i32) {
    %c0_i32 = arith.constant 0 : i32
    %c0_i32_0 = arith.constant 0 : i32
    %c0_i32_1 = arith.constant 0 : i32
    return %c0_i32, %c0_i32_0 : i32, i32
  }
  func.func @transform_8(%arg0: i32) -> (i32, i32) {
    %c0_i32 = arith.constant 0 : i32
    %c0_i32_0 = arith.constant 0 : i32
    %c0_i32_1 = arith.constant 0 : i32
    return %c0_i32, %c0_i32_0 : i32, i32
  }
  func.func @transform_9(%arg0: i32) -> (i32, i32) {
    %c0_i32 = arith.constant 0 : i32
    %c0_i32_0 = arith.constant 0 : i32
    %c0_i32_1 = arith.constant 0 : i32
    return %c0_i32, %c0_i32_0 : i32, i32
  }
  func.func @transform_10(%arg0: i32) -> (i32, i32) {
    %c0_i32 = arith.constant 0 : i32
    %c0_i32_0 = arith.constant 0 : i32
    %c0_i32_1 = arith.constant 0 : i32
    return %c0_i32, %c0_i32_0 : i32, i32
  }
  func.func @transform_11(%arg0: i32) -> (i32, i32) {
    %c0_i32 = arith.constant 0 : i32
    %c0_i32_0 = arith.constant 0 : i32
    return %arg0, %c0_i32 : i32, i32
  }
}

</mosaic_0001>

<bundles_post_ra>
// kernel: tpu_custom_call.1
= control target key start
LH: loop header
LB: loop body
LE: loop exit
PB: predicated region body
PF: predicated region fallthrough
CT: control target
= control target key end

     0   :  { %16 = vsyncpa [#allocation3], 0  ;;  %s2111_s0 = inlined_call_operand.hbm [shape: f32[8,1024], index: 0, kind: input, shape index: {}]   ;;  %s2112_s1 = inlined_call_operand.hbm [shape: f32[8,256], index: 1, kind: input, shape index: {}]   ;;  %s2113_s2 = inlined_call_operand.hbm [shape: f32[1024,128], index: 2, kind: input, shape index: {}]   ;;  %s2114_s3 = inlined_call_operand.vmem [shape: f32[1,128], index: 3, kind: input, shape index: {}]   ;;  %s2115_s4 = inlined_call_operand.hbm [shape: f32[128,512], index: 4, kind: input, shape index: {}]   ;;  %s2116_s5 = inlined_call_operand.vmem [shape: f32[1,512], index: 5, kind: input, shape index: {}]   ;;  %s2117_s6 = inlined_call_operand.hbm [shape: f32[128,128], index: 6, kind: input, shape index: {}]   ;;  %s2118_s7 = inlined_call_operand.hbm [shape: f32[128,128], index: 7, kind: input, shape index: {}]   ;;  %s2119_s8 = inlined_call_operand.vmem [shape: f32[1,128], index: 8, kind: input, shape index: {}]   ;;  %s2120_s9 = inlined_call_operand.hbm [shape: f32[128,128], index: 9, kind: input, shape index: {}]   ;;  %s2121_s10 = inlined_call_operand.vmem [shape: f32[1,128], index: 10, kind: input, shape index: {}]   ;;  %s2122_s11 = inlined_call_operand.hbm [shape: f32[8,384], index: 11, kind: output, shape index: {}]  }
   0x1   :  { %17 = vsyncpa [#allocation6], 0 }
   0x2   :  { %18 = vsyncpa [#allocation9], 0 }
   0x3   :  { %19 = vsyncpa [#allocation12], 0 }
   0x4   :  { %20 = vsyncpa [#allocation4], 0  ;;  %s1870_s17 = smov [#allocation5]   ;;  %s1871_s19 = smov [#allocation8]  }
   0x5   :  { %s37_s18 = sshll.u32 %s1870_s17, 4  ;;  %s60_s20 = sshll.u32 %s1871_s19, 4  ;;  %s38_s18 = int_to_ptr.vmem [resolvable:$true] %s37_s18  ;;  %s1945_s20 = int_to_ptr.vmem [resolvable:$true] %s60_s20 }
   0x6   :  { %s1684_s23 = scalar_lea.hbm %s2112_s1, 256 }
   0x7   :  { %p1685_p0 = scmp.ne.s32.totalorder %s2112_s1, %s1684_s23  ;;  %p1688_p1 = scmp.lt.u32.totalorder %s1684_s23, %s2112_s1 }
   0x9   :  { %p1690_p2 = pnand %p1688_p1, %p1685_p0 }
   0xb   :  { %1693 = shalt.err (!%p1690_p2)
}
   0xc   :  { %s1694_s28 = scalar_lea.vmem %s38_s18, 256  ;;  %p1699_p4 = scmp.lt.s32.totalorder %s38_s18, %s38_s18 }
   0xd   :  { %p1695_p3 = scmp.ne.s32.totalorder %s38_s18, %s1694_s28  ;;  %p1700_p5 = scmp.lt.s32.totalorder %s1694_s28, %s1694_s28 }
   0xf   :  { %p1701_p6 = por %p1700_p5, %p1699_p4 }
  0x11   :  { %p1702_p7 = pnand %p1701_p6, %p1695_p3 }
  0x13   :  { %1705 = shalt.err (!%p1702_p7)
}
  0x14   :  { %40 = dma.hbm_to_vmem [thread:$0]  %s2112_s1, 256, %s38_s18, [#allocation6]  }
  0x15   :  { %s1706_s14 = scalar_lea.hbm %s2115_s4, 8192 }
  0x16   :  { %p1707_p8 = scmp.ne.s32.totalorder %s2115_s4, %s1706_s14  ;;  %p1710_p9 = scmp.lt.u32.totalorder %s1706_s14, %s2115_s4 }
  0x18   :  { %p1712_p10 = pnand %p1710_p9, %p1707_p8 }
  0x1a   :  { %1715 = shalt.err (!%p1712_p10)
}
  0x1b   :  { %s1716_s21 = scalar_lea.vmem %s1945_s20, 8192  ;;  %p1721_p12 = scmp.lt.s32.totalorder %s1945_s20, %s1945_s20 }
  0x1c   :  { %p1717_p11 = scmp.ne.s32.totalorder %s1945_s20, %s1716_s21  ;;  %p1722_p13 = scmp.lt.s32.totalorder %s1716_s21, %s1716_s21 }
  0x1e   :  { %p1723_p0 = por %p1722_p13, %p1721_p12 }
  0x20   :  { %p1724_p1 = pnand %p1723_p0, %p1717_p11 }
  0x22   :  { %1727 = shalt.err (!%p1724_p1)
}
  0x23   :  { %s1872_s1 = smov 512   ;;  %s1873_s18 = smov 32  }
  0x24   :  { %66 = dma.hbm_to_vmem [thread:$0]  %s2115_s4, 8192, %s1945_s20, [#allocation9], %s1872_s1, %s1872_s1, %s1873_s18  }
  0x25   :  { %s1874_s24 = smov [#allocation11]   ;;  %s1875_s26 = smov [#allocation2]  }
  0x26   :  { %s86_s25 = sshll.u32 %s1874_s24, 4  ;;  %s27_s27 = sshll.u32 %s1875_s26, 4  ;;  %s87_s25 = int_to_ptr.vmem [resolvable:$true] %s86_s25  ;;  %s28_s27 = int_to_ptr.vmem [resolvable:$true] %s27_s27 }
  0x27   :  { %s1728_s30 = scalar_lea.hbm %s2118_s7, 2048 }
  0x28   :  { %p1729_p2 = scmp.ne.s32.totalorder %s2118_s7, %s1728_s30  ;;  %p1732_p3 = scmp.lt.u32.totalorder %s1728_s30, %s2118_s7 }
  0x2a   :  { %p1734_p4 = pnand %p1732_p3, %p1729_p2 }
  0x2c   :  { %1737 = shalt.err (!%p1734_p4)
}
  0x2d   :  { %s1738_s4 = scalar_lea.vmem %s87_s25, 2048  ;;  %p1743_p6 = scmp.lt.s32.totalorder %s87_s25, %s87_s25 }
  0x2e   :  { %p1739_p5 = scmp.ne.s32.totalorder %s87_s25, %s1738_s4  ;;  %p1744_p7 = scmp.lt.s32.totalorder %s1738_s4, %s1738_s4 }
  0x30   :  { %p1745_p8 = por %p1744_p7, %p1743_p6 }
  0x32   :  { %p1746_p9 = pnand %p1745_p8, %p1739_p5 }
  0x34   :  { %1749 = shalt.err (!%p1746_p9)
}
  0x35   :  { %s1876_s20 = smov 128   ;;  %s1877_s16 = smov 8  }
  0x36   :  { %92 = dma.hbm_to_vmem [thread:$0]  %s2118_s7, 2048, %s87_s25, [#allocation12], %s1876_s20, %s1876_s20, %s1877_s16  }
  0x37   :  { %s1750_s18 = scalar_lea.hbm %s2111_s0, 1024 }
  0x38   :  { %p1751_p10 = scmp.ne.s32.totalorder %s2111_s0, %s1750_s18  ;;  %p1754_p11 = scmp.lt.u32.totalorder %s1750_s18, %s2111_s0 }
  0x3a   :  { %p1756_p12 = pnand %p1754_p11, %p1751_p10 }
  0x3c   :  { %1759 = shalt.err (!%p1756_p12)
}
  0x3d   :  { %s1760_s28 = scalar_lea.vmem %s28_s27, 1024  ;;  %p1765_p0 = scmp.lt.s32.totalorder %s28_s27, %s28_s27 }
  0x3e   :  { %p1761_p13 = scmp.ne.s32.totalorder %s28_s27, %s1760_s28  ;;  %p1766_p1 = scmp.lt.s32.totalorder %s1760_s28, %s1760_s28 }
  0x40   :  { %p1767_p2 = por %p1766_p1, %p1765_p0 }
  0x42   :  { %p1768_p3 = pnand %p1767_p2, %p1761_p13 }
  0x44   :  { %1771 = shalt.err (!%p1768_p3)
}
  0x45   :  { %30 = dma.hbm_to_vmem [thread:$0]  %s2111_s0, 1024, %s28_s27, [#allocation3]  }
  0x46   :  { %s1878_s29 = smov [#allocation7]   ;;  %s1879_s12 = smov [#allocation10]  }
  0x47   :  { %s46_s30 = sshll.u32 %s1878_s29, 4  ;;  %s74_s13 = sshll.u32 %s1879_s12, 4  ;;  %s47_s30 = int_to_ptr.vmem [resolvable:$true] %s46_s30  ;;  %s2003_s13 = int_to_ptr.vmem [resolvable:$true] %s74_s13 }
  0x48   :  { %s1772_s4 = scalar_lea.hbm %s2113_s2, 16384 }
  0x49   :  { %p1773_p4 = scmp.ne.s32.totalorder %s2113_s2, %s1772_s4  ;;  %p1776_p5 = scmp.lt.u32.totalorder %s1772_s4, %s2113_s2 }
  0x4b   :  { %p1778_p6 = pnand %p1776_p5, %p1773_p4 }
  0x4d   :  { %1781 = shalt.err (!%p1778_p6)
}
  0x4e   :  { %s1782_s0 = scalar_lea.vmem %s47_s30, 16384  ;;  %p1787_p8 = scmp.lt.s32.totalorder %s47_s30, %s47_s30 }
  0x4f   :  { %p1783_p7 = scmp.ne.s32.totalorder %s47_s30, %s1782_s0  ;;  %p1788_p9 = scmp.lt.s32.totalorder %s1782_s0, %s1782_s0 }
  0x51   :  { %p1789_p10 = por %p1788_p9, %p1787_p8 }
  0x53   :  { %p1790_p11 = pnand %p1789_p10, %p1783_p7 }
  0x55   :  { %1793 = shalt.err (!%p1790_p11)
}
  0x56   :  { %52 = dma.hbm_to_vmem [thread:$0]  %s2113_s2, 16384, %s47_s30, [#allocation6], %s1876_s20, %s1876_s20, %s1877_s16  }
  0x57   :  { %s1794_s24 = scalar_lea.hbm %s2117_s6, 2048 }
  0x58   :  { %p1795_p12 = scmp.ne.s32.totalorder %s2117_s6, %s1794_s24  ;;  %p1798_p13 = scmp.lt.u32.totalorder %s1794_s24, %s2117_s6 }
  0x5a   :  { %p1800_p0 = pnand %p1798_p13, %p1795_p12 }
  0x5c   :  { %1803 = shalt.err (!%p1800_p0)
}
  0x5d   :  { %s1804_s29 = scalar_lea.vmem %s2003_s13, 2048  ;;  %p1809_p2 = scmp.lt.s32.totalorder %s2003_s13, %s2003_s13 }
  0x5e   :  { %p1805_p1 = scmp.ne.s32.totalorder %s2003_s13, %s1804_s29  ;;  %p1810_p3 = scmp.lt.s32.totalorder %s1804_s29, %s1804_s29 }
  0x60   :  { %p1811_p4 = por %p1810_p3, %p1809_p2 }
  0x62   :  { %p1812_p5 = pnand %p1811_p4, %p1805_p1 }
  0x64   :  { %1815 = shalt.err (!%p1812_p5)
}
  0x65   :  { %80 = dma.hbm_to_vmem [thread:$0]  %s2117_s6, 2048, %s2003_s13, [#allocation9], %s1876_s20, %s1876_s20, %s1877_s16  }
  0x66   :  { %s1880_s12 = smov [#allocation13]   ;;  %s1816_s17 = scalar_lea.hbm %s2120_s9, 2048 }
  0x67   :  { %s100_s14 = sshll.u32 %s1880_s12, 4  ;;  %p1817_p6 = scmp.ne.s32.totalorder %s2120_s9, %s1816_s17  ;;  %s101_s14 = int_to_ptr.vmem [resolvable:$true] %s100_s14 }
  0x68   :  { %p1820_p7 = scmp.lt.u32.totalorder %s1816_s17, %s2120_s9 }
  0x6a   :  { %p1822_p8 = pnand %p1820_p7, %p1817_p6 }
  0x6c   :  { %1825 = shalt.err (!%p1822_p8)
}
  0x6d   :  { %s1826_s27 = scalar_lea.vmem %s101_s14, 2048  ;;  %p1831_p10 = scmp.lt.s32.totalorder %s101_s14, %s101_s14 }
  0x6e   :  { %p1827_p9 = scmp.ne.s32.totalorder %s101_s14, %s1826_s27  ;;  %p1832_p11 = scmp.lt.s32.totalorder %s1826_s27, %s1826_s27 }
  0x70   :  { %p1833_p12 = por %p1832_p11, %p1831_p10 }
  0x72   :  { %p1834_p13 = pnand %p1833_p12, %p1827_p9 }
  0x74   :  { %1837 = shalt.err (!%p1834_p13)
}
  0x75   :  { %106 = dma.hbm_to_vmem [thread:$0]  %s2120_s9, 2048, %s101_s14, [#allocation12], %s1876_s20, %s1876_s20, %s1877_s16  }
  0x76   :  { %1860 = dma.done.wait [#allocation3], 1024  }
  0x77   :  { %1861 = vsyncadd [#allocation3], 4294966272 }
  0x78   :  { %1862 = dma.done.wait [#allocation6], 16640  }
  0x79   :  { %1863 = vsyncadd [#allocation6], 4294950656 }
  0x7a   :  { %1864 = dma.done.wait [#allocation9], 10240  }
  0x7b   :  { %1865 = vsyncadd [#allocation9], 4294957056 }
  0x7c   :  { %1866 = dma.done.wait [#allocation12], 4096  }
  0x7d   :  { %1867 = vsyncadd [#allocation12], 4294963200  ;;  %v154_v0 = vld [vmem:[#allocation7 + $0x80] sm:$0xff]  ;;  %v155_v1 = vld [vmem:[#allocation7 + $0x88] sm:$0xff]  ;;  %vm1883_vm0 = vmmov 0  }
  0x7e   :  { %v138_v2 = vld [vmem:[#allocation7] sm:$0xff]  ;;  %v1397_v3 = vpack.c.bf16 %v155_v1, %v154_v0  ;;  %v139_v4 = vld [vmem:[#allocation7 + $0x8] sm:$0xff]  ;;  %v156_v11 = vld [vmem:[#allocation7 + $0x90] sm:$0xff] }
  0x7f   :  { %v186_v5 = vld [vmem:[#allocation7 + $0x180] sm:$0xff]  ;;  %v187_v6 = vld [vmem:[#allocation7 + $0x188] sm:$0xff]  ;;  %v1399_v7 = vpack.c.bf16 %v139_v4, %v138_v2  ;;  %v157_v13 = vld [vmem:[#allocation7 + $0x98] sm:$0xff] }
  0x80   :  { %v1429_v8 = vpack.c.bf16 %v187_v6, %v186_v5  ;;  %v170_v9 = vld [vmem:[#allocation7 + $0x100] sm:$0xff]  ;;  %v171_v10 = vld [vmem:[#allocation7 + $0x108] sm:$0xff]  ;;  %1398 = vmatprep.subr.bf16.mxu0 %v1397_v3  ;;  %v140_v14 = vld [vmem:[#allocation7 + $0x10] sm:$0xff]  ;;  %v1401_v16 = vpack.c.bf16 %v157_v13, %v156_v11 }
  0x81   :  { %v1431_v12 = vpack.c.bf16 %v171_v10, %v170_v9  ;;  %v141_v15 = vld [vmem:[#allocation7 + $0x18] sm:$0xff]  ;;  %1400 = vmatpush3.bf16.msra.mxu0 %v1399_v7  ;;  %v188_v18 = vld [vmem:[#allocation7 + $0x190] sm:$0xff]  ;;  %v158_v23 = vld [vmem:[#allocation7 + $0xa0] sm:$0xff] }
  0x82   :  { %1430 = vmatprep.subr.bf16.mxu1 %v1429_v8  ;;  %v1403_v17 = vpack.c.bf16 %v141_v15, %v140_v14  ;;  %v189_v19 = vld [vmem:[#allocation7 + $0x198] sm:$0xff]  ;;  %v172_v20 = vld [vmem:[#allocation7 + $0x110] sm:$0xff]  ;;  %v159_v24 = vld [vmem:[#allocation7 + $0xa8] sm:$0xff]  ;;  %1402 = vmatprep.subr.bf16.mxu0 %v1401_v16 }
  0x83   :  { %1432 = vmatpush3.bf16.msra.mxu1 %v1431_v12  ;;  %v1433_v21 = vpack.c.bf16 %v189_v19, %v188_v18  ;;  %v173_v22 = vld [vmem:[#allocation7 + $0x118] sm:$0xff]  ;;  %v1405_v26 = vpack.c.bf16 %v159_v24, %v158_v23  ;;  %v142_v27 = vld [vmem:[#allocation7 + $0x20] sm:$0xff]  ;;  %v143_v28 = vld [vmem:[#allocation7 + $0x28] sm:$0xff] }
  0x84   :  { %v1435_v25 = vpack.c.bf16 %v173_v22, %v172_v20  ;;  %v190_v29 = vld [vmem:[#allocation7 + $0x1a0] sm:$0xff]  ;;  %v191_v30 = vld [vmem:[#allocation7 + $0x1a8] sm:$0xff]  ;;  %v1407_v33 = vpack.c.bf16 %v143_v28, %v142_v27  ;;  %v160_v35 = vld [vmem:[#allocation7 + $0xb0] sm:$0xff] }
  0x85   :  { %1434 = vmatprep.subr.bf16.mxu1 %v1433_v21  ;;  %v174_v31 = vld [vmem:[#allocation7 + $0x120] sm:$0xff]  ;;  %v175_v32 = vld [vmem:[#allocation7 + $0x128] sm:$0xff]  ;;  %1404 = vmatpush3.bf16.msra.mxu0 %v1403_v17  ;;  %v1437_v34 = vpack.c.bf16 %v191_v30, %v190_v29  ;;  %v161_v36 = vld [vmem:[#allocation7 + $0xb8] sm:$0xff] }
  0x86   :  { %v144_v37 = vld [vmem:[#allocation7 + $0x30] sm:$0xff]  ;;  %1406 = vmatprep.subr.bf16.mxu0 %v1405_v26  ;;  %v1439_v38 = vpack.c.bf16 %v175_v32, %v174_v31  ;;  %v1409_v39 = vpack.c.bf16 %v161_v36, %v160_v35  ;;  %v145_v40 = vld [vmem:[#allocation7 + $0x38] sm:$0xff]  ;;  %v162_v46 = vld [vmem:[#allocation7 + $0xc0] sm:$0xff] }
  0x87   :  { %1436 = vmatpush3.bf16.msra.mxu1 %v1435_v25  ;;  %v192_v41 = vld [vmem:[#allocation7 + $0x1b0] sm:$0xff]  ;;  %v193_v42 = vld [vmem:[#allocation7 + $0x1b8] sm:$0xff]  ;;  %v163_v47 = vld [vmem:[#allocation7 + $0xc8] sm:$0xff]  ;;  %v1411_v48 = vpack.c.bf16 %v145_v40, %v144_v37 }
  0x88   :  { %1438 = vmatprep.subr.bf16.mxu1 %v1437_v34  ;;  %v1441_v43 = vpack.c.bf16 %v193_v42, %v192_v41  ;;  %v176_v44 = vld [vmem:[#allocation7 + $0x130] sm:$0xff]  ;;  %v177_v45 = vld [vmem:[#allocation7 + $0x138] sm:$0xff]  ;;  %v194_v49 = vld [vmem:[#allocation7 + $0x1c0] sm:$0xff]  ;;  %v1413_v52 = vpack.c.bf16 %v163_v47, %v162_v46 }
  0x89   :  { %1408 = vmatpush3.bf16.msra.mxu0 %v1407_v33  ;;  %v195_v50 = vld [vmem:[#allocation7 + $0x1c8] sm:$0xff]  ;;  %v1443_v51 = vpack.c.bf16 %v177_v45, %v176_v44  ;;  %v146_v53 = vld [vmem:[#allocation7 + $0x40] sm:$0xff]  ;;  %v164_v58 = vld [vmem:[#allocation7 + $0xd0] sm:$0xff] }
  0x8a   :  { %1410 = vmatprep.subr.bf16.mxu0 %v1409_v39  ;;  %v147_v54 = vld [vmem:[#allocation7 + $0x48] sm:$0xff]  ;;  %v178_v55 = vld [vmem:[#allocation7 + $0x140] sm:$0xff]  ;;  %v1445_v56 = vpack.c.bf16 %v195_v50, %v194_v49  ;;  %v165_v59 = vld [vmem:[#allocation7 + $0xd8] sm:$0xff] }
  0x8b   :  { %1440 = vmatpush3.bf16.msra.mxu1 %v1439_v38  ;;  %v179_v57 = vld [vmem:[#allocation7 + $0x148] sm:$0xff]  ;;  %v196_v60 = vld [vmem:[#allocation7 + $0x1d0] sm:$0xff]  ;;  %v197_v61 = vld [vmem:[#allocation7 + $0x1d8] sm:$0xff]  ;;  %v1415_v62 = vpack.c.bf16 %v147_v54, %v146_v53  ;;  %v1417_v0 = vpack.c.bf16 %v165_v59, %v164_v58 }
  0x8c   :  { %1442 = vmatprep.subr.bf16.mxu1 %v1441_v43  ;;  %v1447_v63 = vpack.c.bf16 %v179_v57, %v178_v55  ;;  %v148_v1 = vld [vmem:[#allocation7 + $0x50] sm:$0xff]  ;;  %v149_v2 = vld [vmem:[#allocation7 + $0x58] sm:$0xff]  ;;  %v1449_v4 = vpack.c.bf16 %v197_v61, %v196_v60  ;;  %v166_v6 = vld [vmem:[#allocation7 + $0xe0] sm:$0xff] }
  0x8d   :  { %1412 = vmatpush3.bf16.msra.mxu0 %v1411_v48  ;;  %v180_v3 = vld [vmem:[#allocation7 + $0x150] sm:$0xff]  ;;  %v181_v5 = vld [vmem:[#allocation7 + $0x158] sm:$0xff]  ;;  %v167_v7 = vld [vmem:[#allocation7 + $0xe8] sm:$0xff]  ;;  %v1419_v10 = vpack.c.bf16 %v149_v2, %v148_v1 }
  0x8e   :  { %1414 = vmatprep.subr.bf16.mxu0 %v1413_v52  ;;  %v198_v8 = vld [vmem:[#allocation7 + $0x1e0] sm:$0xff]  ;;  %v199_v9 = vld [vmem:[#allocation7 + $0x1e8] sm:$0xff]  ;;  %v1451_v13 = vpack.c.bf16 %v181_v5, %v180_v3  ;;  %v1421_v14 = vpack.c.bf16 %v167_v7, %v166_v6  ;;  %v131_v17 = vld [vmem:[#allocation2 + $0x8] sm:$0xff] }
  0x8f   :  { %1444 = vmatpush3.bf16.msra.mxu1 %v1443_v51  ;;  %v150_v11 = vld [vmem:[#allocation7 + $0x60] sm:$0xff]  ;;  %v151_v12 = vld [vmem:[#allocation7 + $0x68] sm:$0xff]  ;;  %v1453_v18 = vpack.c.bf16 %v199_v9, %v198_v8  ;;  %v168_v19 = vld [vmem:[#allocation7 + $0xf0] sm:$0xff]  ;;  %337 = vmatprep.mubr.f32.mxu0 %v131_v17 }
  0x90   :  { %1446 = vmatprep.subr.bf16.mxu1 %v1445_v56  ;;  %v182_v15 = vld [vmem:[#allocation7 + $0x160] sm:$0xff]  ;;  %v183_v16 = vld [vmem:[#allocation7 + $0x168] sm:$0xff]  ;;  %v169_v20 = vld [vmem:[#allocation7 + $0xf8] sm:$0xff]  ;;  %v1423_v24 = vpack.c.bf16 %v151_v12, %v150_v11 }
  0x91   :  { %1416 = vmatpush3.bf16.msra.mxu0 %v1415_v62  ;;  %v133_v21 = vld [vmem:[#allocation2 + $0x18] sm:$0xff]  ;;  %v200_v22 = vld [vmem:[#allocation7 + $0x1f0] sm:$0xff]  ;;  %v201_v23 = vld [vmem:[#allocation7 + $0x1f8] sm:$0xff]  ;;  %v1455_v25 = vpack.c.bf16 %v183_v16, %v182_v15  ;;  %v1425_v26 = vpack.c.bf16 %v169_v20, %v168_v19 }
  0x92   :  { %1418 = vmatprep.subr.bf16.mxu0 %v1417_v0  ;;  %407 = vmatprep.mubr.f32.mxu1 %v133_v21  ;;  %v152_v27 = vld [vmem:[#allocation7 + $0x70] sm:$0xff]  ;;  %v153_v28 = vld [vmem:[#allocation7 + $0x78] sm:$0xff]  ;;  %v1457_v30 = vpack.c.bf16 %v201_v23, %v200_v22  ;;  %v218_v32 = vld [vmem:[#allocation7 + $0x280] sm:$0xff] }
  0x93   :  { %1448 = vmatpush3.bf16.msra.mxu1 %v1447_v63  ;;  %v184_v29 = vld [vmem:[#allocation7 + $0x170] sm:$0xff]  ;;  %v185_v31 = vld [vmem:[#allocation7 + $0x178] sm:$0xff]  ;;  %v219_v33 = vld [vmem:[#allocation7 + $0x288] sm:$0xff]  ;;  %v1427_v36 = vpack.c.bf16 %v153_v28, %v152_v27 }
  0x94   :  { %1450 = vmatprep.subr.bf16.mxu1 %v1449_v4  ;;  %v250_v34 = vld [vmem:[#allocation7 + $0x380] sm:$0xff]  ;;  %v251_v35 = vld [vmem:[#allocation7 + $0x388] sm:$0xff]  ;;  %v1459_v37 = vpack.c.bf16 %v185_v31, %v184_v29  ;;  %v1461_v38 = vpack.c.bf16 %v219_v33, %v218_v32  ;;  %v220_v44 = vld [vmem:[#allocation7 + $0x290] sm:$0xff] }
  0x95   :  { %1420 = vmatpush3.bf16.msra.mxu0 %v1419_v10  ;;  %v202_v39 = vld [vmem:[#allocation7 + $0x200] sm:$0xff]  ;;  %v203_v40 = vld [vmem:[#allocation7 + $0x208] sm:$0xff]  ;;  %v1493_v42 = vpack.c.bf16 %v251_v35, %v250_v34  ;;  %v221_v45 = vld [vmem:[#allocation7 + $0x298] sm:$0xff] }
  0x96   :  { %1422 = vmatprep.subr.bf16.mxu0 %v1421_v14  ;;  %v234_v41 = vld [vmem:[#allocation7 + $0x300] sm:$0xff]  ;;  %v235_v43 = vld [vmem:[#allocation7 + $0x308] sm:$0xff]  ;;  %v252_v46 = vld [vmem:[#allocation7 + $0x390] sm:$0xff]  ;;  %v1463_v49 = vpack.c.bf16 %v203_v40, %v202_v39  ;;  %v1465_v52 = vpack.c.bf16 %v221_v45, %v220_v44 }
  0x97   :  { %1452 = vmatpush3.bf16.msra.mxu1 %v1451_v13  ;;  %v253_v47 = vld [vmem:[#allocation7 + $0x398] sm:$0xff]  ;;  %v130_v48 = vld [vmem:[#allocation2] sm:$0xff]  ;;  %v132_v50 = vld [vmem:[#allocation2 + $0x10] sm:$0xff]  ;;  %v1495_v51 = vpack.c.bf16 %v235_v43, %v234_v41 }
  0x98   :  { %1454 = vmatprep.subr.bf16.mxu1 %v1453_v18  ;;  %v204_v53 = vld [vmem:[#allocation7 + $0x210] sm:$0xff]  ;;  %v205_v54 = vld [vmem:[#allocation7 + $0x218] sm:$0xff]  ;;  %v1497_v56 = vpack.c.bf16 %v253_v47, %v252_v46  ;;  %v222_v58 = vld [vmem:[#allocation7 + $0x2a0] sm:$0xff] }
  0x99   :  { %1424 = vmatpush3.bf16.msra.mxu0 %v1423_v24  ;;  %v236_v55 = vld [vmem:[#allocation7 + $0x310] sm:$0xff]  ;;  %v237_v57 = vld [vmem:[#allocation7 + $0x318] sm:$0xff]  ;;  %v223_v59 = vld [vmem:[#allocation7 + $0x2a8] sm:$0xff]  ;;  %v1467_v62 = vpack.c.bf16 %v205_v54, %v204_v53 }
  0x9a   :  { %1426 = vmatprep.subr.bf16.mxu0 %v1425_v26  ;;  %v254_v60 = vld [vmem:[#allocation7 + $0x3a0] sm:$0xff]  ;;  %v255_v61 = vld [vmem:[#allocation7 + $0x3a8] sm:$0xff]  ;;  %v1499_v63 = vpack.c.bf16 %v237_v57, %v236_v55  ;;  %v1469_v0 = vpack.c.bf16 %v223_v59, %v222_v58  ;;  %v224_v6 = vld [vmem:[#allocation7 + $0x2b0] sm:$0xff] }
  0x9b   :  { %1456 = vmatpush3.bf16.msra.mxu1 %v1455_v25  ;;  %v206_v1 = vld [vmem:[#allocation7 + $0x220] sm:$0xff]  ;;  %v207_v2 = vld [vmem:[#allocation7 + $0x228] sm:$0xff]  ;;  %v1501_v4 = vpack.c.bf16 %v255_v61, %v254_v60  ;;  %v225_v7 = vld [vmem:[#allocation7 + $0x2b8] sm:$0xff] }
  0x9c   :  { %1458 = vmatprep.subr.bf16.mxu1 %v1457_v30  ;;  %v238_v3 = vld [vmem:[#allocation7 + $0x320] sm:$0xff]  ;;  %v239_v5 = vld [vmem:[#allocation7 + $0x328] sm:$0xff]  ;;  %v256_v8 = vld [vmem:[#allocation7 + $0x3b0] sm:$0xff]  ;;  %v1471_v10 = vpack.c.bf16 %v207_v2, %v206_v1  ;;  %v1473_v12 = vpack.c.bf16 %v225_v7, %v224_v6 }
  0x9d   :  { %1428 = vmatpush3.bf16.msra.mxu0 %v1427_v36  ;;  %v257_v9 = vld [vmem:[#allocation7 + $0x3b8] sm:$0xff]  ;;  %v1503_v11 = vpack.c.bf16 %v239_v5, %v238_v3  ;;  %v208_v13 = vld [vmem:[#allocation7 + $0x230] sm:$0xff]  ;;  %v226_v18 = vld [vmem:[#allocation7 + $0x2c0] sm:$0xff] }
  0x9e   :  { %1462 = vmatprep.subr.bf16.mxu0 %v1461_v38  ;;  %v209_v14 = vld [vmem:[#allocation7 + $0x238] sm:$0xff]  ;;  %v240_v15 = vld [vmem:[#allocation7 + $0x330] sm:$0xff]  ;;  %v1505_v16 = vpack.c.bf16 %v257_v9, %v256_v8  ;;  %v227_v19 = vld [vmem:[#allocation7 + $0x2c8] sm:$0xff] }
  0x9f   :  { %1460 = vmatpush3.bf16.msra.mxu1 %v1459_v37  ;;  %v241_v17 = vld [vmem:[#allocation7 + $0x338] sm:$0xff]  ;;  %v258_v20 = vld [vmem:[#allocation7 + $0x3c0] sm:$0xff]  ;;  %v259_v21 = vld [vmem:[#allocation7 + $0x3c8] sm:$0xff]  ;;  %v1475_v22 = vpack.c.bf16 %v209_v14, %v208_v13  ;;  %v1477_v26 = vpack.c.bf16 %v227_v19, %v226_v18 }
  0xa0   :  { %1494 = vmatprep.subr.bf16.mxu1 %v1493_v42  ;;  %338 = vmatmul.mubr.f32.vlgmr.msra.gmra.mrb[0].mxu0 %v130_v48  ;;  %v135_v23 = vld [vmem:[#allocation2 + $0x28] sm:$0xff]  ;;  %v137_v24 = vld [vmem:[#allocation2 + $0x38] sm:$0xff]  ;;  %v1507_v25 = vpack.c.bf16 %v241_v17, %v240_v15  ;;  %v210_v27 = vld [vmem:[#allocation7 + $0x240] sm:$0xff]  ;;  %v1509_v30 = vpack.c.bf16 %v259_v21, %v258_v20 }
  0xa1   :  { %1464 = vmatpush3.bf16.msra.mxu0 %v1463_v49  ;;  %v211_v28 = vld [vmem:[#allocation7 + $0x248] sm:$0xff]  ;;  %v242_v29 = vld [vmem:[#allocation7 + $0x340] sm:$0xff]  ;;  %v228_v32 = vld [vmem:[#allocation7 + $0x2d0] sm:$0xff]  ;;  %477 = vmatprep.mubr.f32.mxu0 %v135_v23 }
  0xa2   :  { %408 = vmatmul.mubr.f32.vlgmr.msra.gmra.mrb[0].mxu1 %v132_v50  ;;  %1466 = vmatprep.subr.bf16.mxu0 %v1465_v52  ;;  %v243_v31 = vld [vmem:[#allocation7 + $0x348] sm:$0xff]  ;;  %v229_v33 = vld [vmem:[#allocation7 + $0x2d8] sm:$0xff]  ;;  %v260_v34 = vld [vmem:[#allocation7 + $0x3d0] sm:$0xff]  ;;  %v1479_v36 = vpack.c.bf16 %v211_v28, %v210_v27 }
  0xa3   :  { %1496 = vmatpush3.bf16.msra.mxu1 %v1495_v51  ;;  %v261_v35 = vld [vmem:[#allocation7 + $0x3d8] sm:$0xff]  ;;  %547 = vmatprep.mubr.f32.mxu1 %v137_v24  ;;  %v1511_v37 = vpack.c.bf16 %v243_v31, %v242_v29  ;;  %v1481_v38 = vpack.c.bf16 %v229_v33, %v228_v32  ;;  %v212_v39 = vld [vmem:[#allocation7 + $0x250] sm:$0xff]  ;;  %v230_v44 = vld [vmem:[#allocation7 + $0x2e0] sm:$0xff] }
  0xa4   :  { %1498 = vmatprep.subr.bf16.mxu1 %v1497_v56  ;;  %v213_v40 = vld [vmem:[#allocation7 + $0x258] sm:$0xff]  ;;  %v244_v41 = vld [vmem:[#allocation7 + $0x350] sm:$0xff]  ;;  %v1513_v42 = vpack.c.bf16 %v261_v35, %v260_v34  ;;  %v231_v45 = vld [vmem:[#allocation7 + $0x2e8] sm:$0xff] }
  0xa5   :  { %1468 = vmatpush3.bf16.msra.mxu0 %v1467_v62  ;;  %v245_v43 = vld [vmem:[#allocation7 + $0x358] sm:$0xff]  ;;  %v262_v46 = vld [vmem:[#allocation7 + $0x3e0] sm:$0xff]  ;;  %v263_v47 = vld [vmem:[#allocation7 + $0x3e8] sm:$0xff]  ;;  %v1483_v48 = vpack.c.bf16 %v213_v40, %v212_v39  ;;  %v1485_v50 = vpack.c.bf16 %v231_v45, %v230_v44 }
  0xa6   :  { %1470 = vmatprep.subr.bf16.mxu0 %v1469_v0  ;;  %v1515_v49 = vpack.c.bf16 %v245_v43, %v244_v41  ;;  %v214_v51 = vld [vmem:[#allocation7 + $0x260] sm:$0xff]  ;;  %v215_v52 = vld [vmem:[#allocation7 + $0x268] sm:$0xff]  ;;  %v1517_v54 = vpack.c.bf16 %v263_v47, %v262_v46  ;;  %v232_v56 = vld [vmem:[#allocation7 + $0x2f0] sm:$0xff] }
  0xa7   :  { %1500 = vmatpush3.bf16.msra.mxu1 %v1499_v63  ;;  %v246_v53 = vld [vmem:[#allocation7 + $0x360] sm:$0xff]  ;;  %v247_v55 = vld [vmem:[#allocation7 + $0x368] sm:$0xff]  ;;  %v233_v57 = vld [vmem:[#allocation7 + $0x2f8] sm:$0xff]  ;;  %v1487_v60 = vpack.c.bf16 %v215_v52, %v214_v51 }
  0xa8   :  { %1502 = vmatprep.subr.bf16.mxu1 %v1501_v4  ;;  %v264_v58 = vld [vmem:[#allocation7 + $0x3f0] sm:$0xff]  ;;  %v265_v59 = vld [vmem:[#allocation7 + $0x3f8] sm:$0xff]  ;;  %v1519_v61 = vpack.c.bf16 %v247_v55, %v246_v53  ;;  %v1489_v62 = vpack.c.bf16 %v233_v57, %v232_v56  ;;  %v136_v7 = vld [vmem:[#allocation2 + $0x30] sm:$0xff] }
  0xa9   :  { %1472 = vmatpush3.bf16.msra.mxu0 %v1471_v10  ;;  %v216_v63 = vld [vmem:[#allocation7 + $0x270] sm:$0xff]  ;;  %v217_v0 = vld [vmem:[#allocation7 + $0x278] sm:$0xff]  ;;  %v1521_v1 = vpack.c.bf16 %v265_v59, %v264_v58  ;;  %v555_v8 = vld [vmem:[#allocation8 + $0x8] sm:$0xff] }
  0xaa   :  { %1474 = vmatprep.subr.bf16.mxu0 %v1473_v12  ;;  %v248_v2 = vld [vmem:[#allocation7 + $0x370] sm:$0xff]  ;;  %v249_v3 = vld [vmem:[#allocation7 + $0x378] sm:$0xff]  ;;  %v1491_v4 = vpack.c.bf16 %v217_v0, %v216_v63  ;;  %v559_v9 = vld [vmem:[#allocation8 + $0x28] sm:$0xff] }
  0xab   :  { %1504 = vmatpush3.bf16.msra.mxu1 %v1503_v11  ;;  %v1523_v5 = vpack.c.bf16 %v249_v3, %v248_v2  ;;  %v134_v6 = vld [vmem:[#allocation2 + $0x20] sm:$0xff]  ;;  %v557_v10 = vld [vmem:[#allocation8 + $0x18] sm:$0xff]  ;;  %v1525_v11 = vpack.c.bf16 %v559_v9, %v555_v8  ;;  %v554_v13 = vld [vmem:[#allocation8] sm:$0xff] }
  0xac   :  { %1506 = vmatprep.subr.bf16.mxu1 %v1505_v16  ;;  %v561_v12 = vld [vmem:[#allocation8 + $0x38] sm:$0xff]  ;;  %v558_v14 = vld [vmem:[#allocation8 + $0x20] sm:$0xff]  ;;  %v556_v17 = vld [vmem:[#allocation8 + $0x10] sm:$0xff] }
  0xad   :  { %1476 = vmatpush3.bf16.msra.mxu0 %v1475_v22  ;;  %v1557_v15 = vpack.c.bf16 %v561_v12, %v557_v10  ;;  %v1527_v16 = vpack.c.bf16 %v558_v14, %v554_v13  ;;  %v560_v18 = vld [vmem:[#allocation8 + $0x30] sm:$0xff]  ;;  %v563_v19 = vld [vmem:[#allocation8 + $0x48] sm:$0xff]  ;;  %v565_v22 = vld [vmem:[#allocation8 + $0x58] sm:$0xff] }
  0xae   :  { %1478 = vmatprep.subr.bf16.mxu0 %v1477_v26  ;;  %v1559_v20 = vpack.c.bf16 %v560_v18, %v556_v17  ;;  %v567_v21 = vld [vmem:[#allocation8 + $0x68] sm:$0xff]  ;;  %v569_v23 = vld [vmem:[#allocation8 + $0x78] sm:$0xff]  ;;  %v562_v26 = vld [vmem:[#allocation8 + $0x40] sm:$0xff] }
  0xaf   :  { %1508 = vmatpush3.bf16.msra.mxu1 %v1507_v25  ;;  %v1529_v24 = vpack.c.bf16 %v567_v21, %v563_v19  ;;  %v1561_v25 = vpack.c.bf16 %v569_v23, %v565_v22  ;;  %v566_v27 = vld [vmem:[#allocation8 + $0x60] sm:$0xff]  ;;  %v564_v28 = vld [vmem:[#allocation8 + $0x50] sm:$0xff]  ;;  %v571_v31 = vld [vmem:[#allocation8 + $0x88] sm:$0xff] }
  0xb0   :  { %1510 = vmatprep.subr.bf16.mxu1 %v1509_v30  ;;  %v1531_v29 = vpack.c.bf16 %v566_v27, %v562_v26  ;;  %v568_v30 = vld [vmem:[#allocation8 + $0x70] sm:$0xff]  ;;  %v575_v32 = vld [vmem:[#allocation8 + $0xa8] sm:$0xff]  ;;  %v573_v35 = vld [vmem:[#allocation8 + $0x98] sm:$0xff] }
  0xb1   :  { %1480 = vmatpush3.bf16.msra.mxu0 %v1479_v36  ;;  %v1563_v33 = vpack.c.bf16 %v568_v30, %v564_v28  ;;  %v1533_v34 = vpack.c.bf16 %v575_v32, %v571_v31  ;;  %v577_v36 = vld [vmem:[#allocation8 + $0xb8] sm:$0xff]  ;;  %v574_v39 = vld [vmem:[#allocation8 + $0xa0] sm:$0xff]  ;;  %v572_v40 = vld [vmem:[#allocation8 + $0x90] sm:$0xff] }
  0xb2   :  { %1482 = vmatprep.subr.bf16.mxu0 %v1481_v38  ;;  %v1565_v38 = vpack.c.bf16 %v577_v36, %v573_v35  ;;  %v576_v41 = vld [vmem:[#allocation8 + $0xb0] sm:$0xff]  ;;  %v579_v43 = vld [vmem:[#allocation8 + $0xc8] sm:$0xff]  ;;  %v581_v45 = vld [vmem:[#allocation8 + $0xd8] sm:$0xff] }
  0xb3   :  { %1512 = vmatpush3.bf16.msra.mxu1 %v1511_v37  ;;  %v570_v37 = vld [vmem:[#allocation8 + $0x80] sm:$0xff]  ;;  %v583_v44 = vld [vmem:[#allocation8 + $0xe8] sm:$0xff]  ;;  %v1567_v46 = vpack.c.bf16 %v576_v41, %v572_v40  ;;  %v580_v52 = vld [vmem:[#allocation8 + $0xd0] sm:$0xff]  ;;  %v1881_v40 = vmov 0.0   ;;  %v1882_v41 = vmov 0.0|0.0  }
  0xb4   :  { %1514 = vmatprep.subr.bf16.mxu1 %v1513_v42  ;;  %v1535_v42 = vpack.c.bf16 %v574_v39, %v570_v37  ;;  %v1537_v47 = vpack.c.bf16 %v583_v44, %v579_v43  ;;  %v584_v53 = vld [vmem:[#allocation8 + $0xf0] sm:$0xff]  ;;  %v591_v55 = vld [vmem:[#allocation8 + $0x128] sm:$0xff]  ;;  %v589_v56 = vld [vmem:[#allocation8 + $0x118] sm:$0xff] }
  0xb5   :  { %1484 = vmatpush3.bf16.msra.mxu0 %v1483_v48  ;;  %v585_v48 = vld [vmem:[#allocation8 + $0xf8] sm:$0xff]  ;;  %v1571_v59 = vpack.c.bf16 %v584_v53, %v580_v52  ;;  %v588_v63 = vld [vmem:[#allocation8 + $0x110] sm:$0xff]  ;;  %v595_v2 = vld [vmem:[#allocation8 + $0x148] sm:$0xff] }
  0xb6   :  { %1486 = vmatprep.subr.bf16.mxu0 %v1485_v50  ;;  %v582_v50 = vld [vmem:[#allocation8 + $0xe0] sm:$0xff]  ;;  %v1569_v51 = vpack.c.bf16 %v585_v48, %v581_v45  ;;  %v593_v57 = vld [vmem:[#allocation8 + $0x138] sm:$0xff]  ;;  %v599_v3 = vld [vmem:[#allocation8 + $0x168] sm:$0xff] }
  0xb7   :  { %1516 = vmatpush3.bf16.msra.mxu1 %v1515_v49  ;;  %v578_v49 = vld [vmem:[#allocation8 + $0xc0] sm:$0xff]  ;;  %v1573_v0 = vpack.c.bf16 %v593_v57, %v589_v56  ;;  %v1545_v8 = vpack.c.bf16 %v599_v3, %v595_v2  ;;  %v596_v12 = vld [vmem:[#allocation8 + $0x150] sm:$0xff]  ;;  %v607_v17 = vld [vmem:[#allocation8 + $0x1a8] sm:$0xff] }
  0xb8   :  { %1518 = vmatprep.subr.bf16.mxu1 %v1517_v54  ;;  %v587_v54 = vld [vmem:[#allocation8 + $0x108] sm:$0xff]  ;;  %v1539_v58 = vpack.c.bf16 %v582_v50, %v578_v49  ;;  %v594_v9 = vld [vmem:[#allocation8 + $0x140] sm:$0xff]  ;;  %v600_v13 = vld [vmem:[#allocation8 + $0x170] sm:$0xff] }
  0xb9   :  { %1488 = vmatpush3.bf16.msra.mxu0 %v1487_v60  ;;  %v1541_v60 = vpack.c.bf16 %v591_v55, %v587_v54  ;;  %v598_v10 = vld [vmem:[#allocation8 + $0x160] sm:$0xff]  ;;  %v605_v18 = vld [vmem:[#allocation8 + $0x198] sm:$0xff]  ;;  %v608_v26 = vld [vmem:[#allocation8 + $0x1b0] sm:$0xff] }
  0xba   :  { %1490 = vmatprep.subr.bf16.mxu0 %v1489_v62  ;;  %v590_v62 = vld [vmem:[#allocation8 + $0x120] sm:$0xff]  ;;  %v1547_v14 = vpack.c.bf16 %v598_v10, %v594_v9  ;;  %v611_v28 = vld [vmem:[#allocation8 + $0x1c8] sm:$0xff]  ;;  %v613_v30 = vld [vmem:[#allocation8 + $0x1d8] sm:$0xff] }
  0xbb   :  { %1520 = vmatpush3.bf16.msra.mxu1 %v1519_v61  ;;  %v586_v61 = vld [vmem:[#allocation8 + $0x100] sm:$0xff]  ;;  %v617_v32 = vld [vmem:[#allocation8 + $0x1f8] sm:$0xff]  ;;  %v612_v37 = vld [vmem:[#allocation8 + $0x1d0] sm:$0xff] }
  0xbc   :  { %1522 = vmatprep.subr.bf16.mxu1 %v1521_v1  ;;  %v592_v1 = vld [vmem:[#allocation8 + $0x130] sm:$0xff]  ;;  %v602_v21 = vld [vmem:[#allocation8 + $0x180] sm:$0xff]  ;;  %v1585_v35 = vpack.c.bf16 %v617_v32, %v613_v30  ;;  %v813_v3 = vld [vmem:[#allocation11 + $0x18] sm:$0xff] }
  0xbd   :  { %1492 = vmatpush3.bf16.msra.mxu0 %v1491_v4  ;;  %v597_v4 = vld [vmem:[#allocation8 + $0x158] sm:$0xff]  ;;  %v606_v22 = vld [vmem:[#allocation8 + $0x1a0] sm:$0xff]  ;;  %v1098_v43 = vld [vmem:[%s2114_s3] ss:$0 sm:$0xff] }
  0xbe   :  { %1526 = vmatprep.subr.bf16.mxu0 %v1525_v11  ;;  %v810_v57 = vld [vmem:[#allocation11] sm:$0xff]  ;;  %v815_v9 = vld [vmem:[#allocation11 + $0x28] sm:$0xff]  ;;  %v805_v30 = vld [vmem:[#allocation10 + $0x58] sm:$0xff] }
  0xbf   :  { %1524 = vmatpush3.bf16.msra.mxu1 %v1523_v5  ;;  %v601_v5 = vld [vmem:[#allocation8 + $0x178] sm:$0xff]  ;;  %v798_v10 = vld [vmem:[#allocation10 + $0x20] sm:$0xff]  ;;  %v823_v32 = vld [vmem:[#allocation11 + $0x68] sm:$0xff] }
  0xc0   :  { %478 = vmatmul.mubr.f32.vlgmr.msra.gmra.mrb[2].mxu0 %v134_v6  ;;  %1558 = vmatprep.subr.bf16.mxu1 %v1557_v15  ;;  %v1543_v6 = vpack.c.bf16 %v590_v62, %v586_v61  ;;  %v1577_v11 = vpack.c.bf16 %v601_v5, %v597_v4  ;;  %v1579_v15 = vpack.c.bf16 %v600_v13, %v596_v12  ;;  %v795_v61 = vld [vmem:[#allocation10 + $0x8] sm:$0xff]  ;;  %v796_v4 = vld [vmem:[#allocation10 + $0x10] sm:$0xff]  ;;  %v797_v5 = vld [vmem:[#allocation10 + $0x18] sm:$0xff] }
  0xc1   :  { %1528 = vmatpush1.bf16.msra.mxu0 %v1527_v16  ;;  %v603_v16 = vld [vmem:[#allocation8 + $0x188] sm:$0xff]  ;;  %704 = vmatprep.mubr.f32.mxu0 %v1881_v40 }
  0xc2   :  { %548 = vmatmul.mubr.f32.vlgmr.msra.gmra.mrb[2].mxu1 %v136_v7  ;;  %1530 = vmatprep.subr.bf16.mxu0 %v1529_v24  ;;  %v1575_v7 = vpack.c.bf16 %v592_v1, %v588_v63  ;;  %v1549_v19 = vpack.c.bf16 %v607_v17, %v603_v16  ;;  %v1551_v24 = vpack.c.bf16 %v606_v22, %v602_v21  ;;  %v812_v1 = vld [vmem:[#allocation11 + $0x10] sm:$0xff]  ;;  %v799_v12 = vld [vmem:[#allocation10 + $0x28] sm:$0xff]  ;;  %v802_v22 = vld [vmem:[#allocation10 + $0x40] sm:$0xff] }
  0xc3   :  { %1560 = vmatpush1.bf16.msra.mxu1 %v1559_v20  ;;  %v609_v20 = vld [vmem:[#allocation8 + $0x1b8] sm:$0xff]  ;;  %775 = vmatprep.mubr.f32.mxu1 %v1881_v40  ;;  %v1620_v13 = vpack.c.bf16 %v799_v12, %v798_v10  ;;  %v800_v16 = vld [vmem:[#allocation10 + $0x30] sm:$0xff]  ;;  %v819_v21 = vld [vmem:[#allocation11 + $0x48] sm:$0xff] }
  0xc4   :  { %1562 = vmatprep.subr.bf16.mxu1 %v1561_v25  ;;  %v1581_v23 = vpack.c.bf16 %v609_v20, %v605_v18  ;;  %v604_v25 = vld [vmem:[#allocation8 + $0x190] sm:$0xff]  ;;  %v801_v18 = vld [vmem:[#allocation10 + $0x38] sm:$0xff]  ;;  %v818_v20 = vld [vmem:[#allocation11 + $0x40] sm:$0xff] }
  0xc5   :  { %1532 = vmatpush1.bf16.msra.mxu0 %v1531_v29  ;;  %v1583_v27 = vpack.c.bf16 %v608_v26, %v604_v25  ;;  %v615_v29 = vld [vmem:[#allocation8 + $0x1e8] sm:$0xff]  ;;  %v820_v26 = vld [vmem:[#allocation11 + $0x50] sm:$0xff] }
  0xc6   :  { %1534 = vmatprep.subr.bf16.mxu0 %v1533_v34  ;;  %v1553_v31 = vpack.c.bf16 %v615_v29, %v611_v28  ;;  %v614_v34 = vld [vmem:[#allocation8 + $0x1e0] sm:$0xff]  ;;  %v804_v28 = vld [vmem:[#allocation10 + $0x50] sm:$0xff] }
  0xc7   :  { %1564 = vmatpush1.bf16.msra.mxu1 %v1563_v33  ;;  %v610_v33 = vld [vmem:[#allocation8 + $0x1c0] sm:$0xff] }
  0xc8   :  { %1566 = vmatprep.subr.bf16.mxu1 %v1565_v38  ;;  %v1555_v36 = vpack.c.bf16 %v614_v34, %v610_v33  ;;  %v616_v38 = vld [vmem:[#allocation8 + $0x1f0] sm:$0xff]  ;;  %v1629_v33 = vpack.c.bf16 %v805_v30, %v804_v28  ;;  %v806_v34 = vld [vmem:[#allocation10 + $0x60] sm:$0xff] }
  0xc9   :  { %1536 = vmatpush1.bf16.msra.mxu0 %v1535_v42  ;;  %v1587_v39 = vpack.c.bf16 %v616_v38, %v612_v37  ;;  %v824_v38 = vld [vmem:[#allocation11 + $0x70] sm:$0xff]  ;;  %v987_v30 = vld [vmem:[#allocation13 + $0x60] sm:$0xff] }
  0xca   :  { %1538 = vmatprep.subr.bf16.mxu0 %v1537_v47  ;;  %v985_v28 = vld [vmem:[#allocation13 + $0x50] sm:$0xff] }
  0xcb   :  { %1568 = vmatpush1.bf16.msra.mxu1 %v1567_v46 }
  0xcc   :  { %1570 = vmatprep.subr.bf16.mxu1 %v1569_v51 }
  0xcd   :  { %1540 = vmatpush1.bf16.msra.mxu0 %v1539_v58 }
  0xce   :  { %1542 = vmatprep.subr.bf16.mxu0 %v1541_v60  ;;  %v794_v60 = vld [vmem:[#allocation10] sm:$0xff] }
  0xcf   :  { %1572 = vmatpush1.bf16.msra.mxu1 %v1571_v59  ;;  %v811_v59 = vld [vmem:[#allocation11 + $0x8] sm:$0xff] }
  0xd0   :  { %1574 = vmatprep.subr.bf16.mxu1 %v1573_v0  ;;  %v1590_v63 = vpack.c.bf16 %v811_v59, %v810_v57  ;;  %v1614_v0 = vpack.c.bf16 %v795_v61, %v794_v60 }
  0xd1   :  { %1544 = vmatpush1.bf16.msra.mxu0 %v1543_v6  ;;  %v1593_v6 = vpack.c.bf16 %v813_v3, %v812_v1  ;;  %v782_v3 = vld [vmem:[#allocation5] sm:$0xff] }
  0xd2   :  { %1546 = vmatprep.subr.bf16.mxu0 %v1545_v8  ;;  %v814_v8 = vld [vmem:[#allocation11 + $0x20] sm:$0xff] }
  0xd3   :  { %1576 = vmatpush1.bf16.msra.mxu1 %v1575_v7  ;;  %v1617_v7 = vpack.c.bf16 %v797_v5, %v796_v4  ;;  %v783_v4 = vld [vmem:[#allocation5 + $0x8] sm:$0xff]  ;;  %v975_v5 = vld [vmem:[#allocation13] sm:$0xff] }
  0xd4   :  { %1578 = vmatprep.subr.bf16.mxu1 %v1577_v11  ;;  %v1596_v11 = vpack.c.bf16 %v815_v9, %v814_v8 }
  0xd5   :  { %1548 = vmatpush1.bf16.msra.mxu0 %v1547_v14  ;;  %v816_v14 = vld [vmem:[#allocation11 + $0x30] sm:$0xff] }
  0xd6   :  { %1550 = vmatprep.subr.bf16.mxu0 %v1549_v19  ;;  %v1623_v19 = vpack.c.bf16 %v801_v18, %v800_v16  ;;  %v978_v16 = vld [vmem:[#allocation13 + $0x18] sm:$0xff] }
  0xd7   :  { %1580 = vmatpush1.bf16.msra.mxu1 %v1579_v15  ;;  %v817_v15 = vld [vmem:[#allocation11 + $0x38] sm:$0xff] }
  0xd8   :  { %1582 = vmatprep.subr.bf16.mxu1 %v1581_v23  ;;  %v1599_v17 = vpack.c.bf16 %v817_v15, %v816_v14  ;;  %v1602_v23 = vpack.c.bf16 %v819_v21, %v818_v20  ;;  %v977_v15 = vld [vmem:[#allocation13 + $0x10] sm:$0xff]  ;;  %v980_v20 = vld [vmem:[#allocation13 + $0x28] sm:$0xff] }
  0xd9   :  { %1552 = vmatpush1.bf16.msra.mxu0 %v1551_v24  ;;  %v803_v24 = vld [vmem:[#allocation10 + $0x48] sm:$0xff]  ;;  %v1641_v18 = vpack.c.bf16 %v978_v16, %v977_v15 }
  0xda   :  { %1554 = vmatprep.subr.bf16.mxu0 %v1553_v31  ;;  %v1626_v25 = vpack.c.bf16 %v803_v24, %v802_v22  ;;  %v822_v31 = vld [vmem:[#allocation11 + $0x60] sm:$0xff]  ;;  %v981_v22 = vld [vmem:[#allocation13 + $0x30] sm:$0xff] }
  0xdb   :  { %1584 = vmatpush1.bf16.msra.mxu1 %v1583_v27  ;;  %v821_v27 = vld [vmem:[#allocation11 + $0x58] sm:$0xff] }
  0xdc   :  { %1586 = vmatprep.subr.bf16.mxu1 %v1585_v35  ;;  %v1605_v29 = vpack.c.bf16 %v821_v27, %v820_v26  ;;  %v807_v35 = vld [vmem:[#allocation10 + $0x68] sm:$0xff] }
  0xdd   :  { %1556 = vmatpush1.bf16.msra.mxu0 %v1555_v36  ;;  %v1608_v36 = vpack.c.bf16 %v823_v32, %v822_v31  ;;  %v1632_v37 = vpack.c.bf16 %v807_v35, %v806_v34  ;;  %v984_v26 = vld [vmem:[#allocation13 + $0x48] sm:$0xff]  ;;  %v990_v34 = vld [vmem:[#allocation13 + $0x78] sm:$0xff] }
  0xde   :  { %1589 = vmatprep.subr.bf16.mxu0 %v1882_v41  ;;  %v988_v31 = vld [vmem:[#allocation13 + $0x68] sm:$0xff] }
  0xdf   :  { %1588 = vmatpush1.bf16.msra.mxu1 %v1587_v39  ;;  %v825_v39 = vld [vmem:[#allocation11 + $0x78] sm:$0xff]  ;;  %v1656_v32 = vpack.c.bf16 %v988_v31, %v987_v30 }
  0xe0   :  { %1613 = vmatprep.subr.bf16.mxu1 %v1882_v41 }
 0x173   :  { %v1133_v42 = vpop.f32.mrb[0].mxu0 }
 0x174   :  { %v1134_v44 = vpop.f32.mrb[1].mxu0 }
 0x175   :  { %v1168_v45 = vpop.f32.mrb[0].mxu1  ;;  %v1135_v46 = vadd.f32 %v1134_v44, %v1133_v42  ;;  %v808_v42 = vld [vmem:[#allocation10 + $0x70] sm:$0xff]  ;;  %v1611_v44 = vpack.c.bf16 %v825_v39, %v824_v38 }
 0x176   :  { %v1169_v47 = vpop.f32.mrb[1].mxu1  ;;  %v1099_v38 = vld [vmem:[%s2119_s8] ss:$0 sm:$0xff]  ;;  %s1884_s8 = smov [#allocation14]  }
 0x177   :  { %v1170_v48 = vadd.f32 %v1169_v47, %v1168_v45  ;;  %v340_v49 = vadd.f32 %v1135_v46, %v1098_v43  ;;  %v809_v43 = vld [vmem:[#allocation10 + $0x78] sm:$0xff]  ;;  %v620_v46 = vlaneseq  ;;  %s1086_s24 = sshll.u32 %s1884_s8, 4  ;;  %s1087_s24 = int_to_ptr.vmem [resolvable:$true] %s1086_s24 }
 0x178   :  { %v1635_v45 = vpack.c.bf16 %v809_v43, %v808_v42  ;;  %s1838_s26 = scalar_lea.vmem %s1087_s24, 384  ;;  %p1843_p1 = scmp.lt.s32.totalorder %s1087_s24, %s1087_s24 }
 0x179   :  { %v410_v50 = vadd.f32 %v1170_v48, %v340_v49  ;;  %v621_v47 = vshrl.u32 %v620_v46, 7  ;;  %p1839_p0 = scmp.ne.s32.totalorder %s1087_s24, %s1838_s26  ;;  %p1844_p2 = scmp.lt.s32.totalorder %s1838_s26, %s1838_s26 }
 0x17b   :  { %v626_v48 = vsub.s32 1, %v621_v47  ;;  %v634_v49 = vsub.s32 3, %v621_v47  ;;  %p1845_p3 = por %p1844_p2, %p1843_p1 }
 0x17d   :  { %p1846_p4 = pnand %p1845_p3, %p1839_p0 }
 0x193   :  { %v1203_v51 = vpop.f32.mrb[2].mxu0 }
 0x194   :  { %v1204_v52 = vpop.f32.mrb[3].mxu0 }
 0x195   :  { %v1238_v53 = vpop.f32.mrb[2].mxu1  ;;  %v1205_v54 = vadd.f32 %v1204_v52, %v1203_v51 }
 0x196   :  { %v1239_v55 = vpop.f32.mrb[3].mxu1 }
 0x197   :  { %v1240_v56 = vadd.f32 %v1239_v55, %v1238_v53  ;;  %v480_v58 = vadd.f32 %v1205_v54, %v410_v50  ;;  %v618_v50 = vld [vmem:[%s2116_s5] sm:$0xf] }
 0x198   :  { %v627_v51 = vrot.slane %v618_v50, %v626_v48  ;;  %v635_v52 = vrot.slane %v618_v50, %v634_v49 }
 0x199   :  { %v550_v62 = vadd.f32 %v1240_v56, %v480_v58 }
 0x19b   :  { %v553_v2 = vmax.f32 %v550_v62, 0.0 }
 0x19d   :  { %705 = vmatmul.mubr.f32.vlgmr.msra.gmra.mrb[4].mxu0 %v553_v2  ;;  %776 = vmatmul.mubr.f32.vlgmr.msra.gmra.mrb[4].mxu1 %v553_v2 }
 0x19e   :  { %1591 = vmatpush3.bf16.msra.mxu0 %v1590_v63  ;;  %1615 = vmatpush3.bf16.msra.mxu1 %v1614_v0  ;;  %v622_v63 = vsub.s32 0, %v621_v47  ;;  %v630_v0 = vsub.s32 2, %v621_v47 }
 0x19f   :  { %1592 = vmatprep.subr.bf16.mxu0 %v1882_v41  ;;  %1616 = vmatprep.subr.bf16.mxu1 %v1882_v41 }
 0x1a0   :  { %1324 = vmatprep.mubr.msk.f32.mxu0 %vm1883_vm0, %v1881_v40  ;;  %1359 = vmatprep.mubr.msk.f32.mxu1 %vm1883_vm0, %v1881_v40  ;;  %v623_v1 = vrot.slane %v618_v50, %v622_v63  ;;  %v631_v2 = vrot.slane %v618_v50, %v630_v0 }
 0x1a2   :  { %1594 = vmatpush3.bf16.msra.mxu0 %v1593_v6  ;;  %1618 = vmatpush3.bf16.msra.mxu1 %v1617_v7  ;;  %v976_v6 = vld [vmem:[#allocation13 + $0x8] sm:$0xff] }
 0x1a3   :  { %1595 = vmatprep.subr.bf16.mxu0 %v1882_v41  ;;  %1619 = vmatprep.subr.bf16.mxu1 %v1882_v41 }
 0x1a6   :  { %1597 = vmatpush3.bf16.msra.mxu0 %v1596_v11  ;;  %1621 = vmatpush3.bf16.msra.mxu1 %v1620_v13  ;;  %v1638_v13 = vpack.c.bf16 %v976_v6, %v975_v5 }
 0x1a7   :  { %1598 = vmatprep.subr.bf16.mxu0 %v1882_v41  ;;  %1622 = vmatprep.subr.bf16.mxu1 %v1882_v41 }
 0x1aa   :  { %1600 = vmatpush3.bf16.msra.mxu0 %v1599_v17  ;;  %1624 = vmatpush3.bf16.msra.mxu1 %v1623_v19  ;;  %v979_v19 = vld [vmem:[#allocation13 + $0x20] sm:$0xff] }
 0x1ab   :  { %1601 = vmatprep.subr.bf16.mxu0 %v1882_v41  ;;  %1625 = vmatprep.subr.bf16.mxu1 %v1882_v41  ;;  %v1644_v21 = vpack.c.bf16 %v980_v20, %v979_v19 }
 0x1ae   :  { %1603 = vmatpush3.bf16.msra.mxu0 %v1602_v23  ;;  %1627 = vmatpush3.bf16.msra.mxu1 %v1626_v25  ;;  %v982_v23 = vld [vmem:[#allocation13 + $0x38] sm:$0xff]  ;;  %v983_v25 = vld [vmem:[#allocation13 + $0x40] sm:$0xff] }
 0x1af   :  { %1604 = vmatprep.subr.bf16.mxu0 %v1882_v41  ;;  %1628 = vmatprep.subr.bf16.mxu1 %v1882_v41  ;;  %v1647_v24 = vpack.c.bf16 %v982_v23, %v981_v22  ;;  %v1650_v27 = vpack.c.bf16 %v984_v26, %v983_v25 }
 0x1b2   :  { %1606 = vmatpush3.bf16.msra.mxu0 %v1605_v29  ;;  %1630 = vmatpush3.bf16.msra.mxu1 %v1629_v33  ;;  %v986_v29 = vld [vmem:[#allocation13 + $0x58] sm:$0xff]  ;;  %v989_v33 = vld [vmem:[#allocation13 + $0x70] sm:$0xff] }
 0x1b3   :  { %1607 = vmatprep.subr.bf16.mxu0 %v1882_v41  ;;  %1631 = vmatprep.subr.bf16.mxu1 %v1882_v41  ;;  %v1659_v35 = vpack.c.bf16 %v990_v34, %v989_v33 }
 0x1b6   :  { %1609 = vmatpush3.bf16.msra.mxu0 %v1608_v36  ;;  %1633 = vmatpush3.bf16.msra.mxu1 %v1632_v37 }
 0x1b7   :  { %1610 = vmatprep.subr.bf16.mxu0 %v1882_v41  ;;  %1634 = vmatprep.subr.bf16.mxu1 %v1882_v41 }
 0x1ba   :  { %1612 = vmatpush3.bf16.msra.mxu0 %v1611_v44  ;;  %1636 = vmatpush3.bf16.msra.mxu1 %v1635_v45 }
 0x1bb   :  { %1637 = vmatprep.subr.bf16.mxu0 %v1882_v41 }
 0x270   :  { %v706_v53 = vpop.f32.mrb[4].mxu0  ;;  %v777_v54 = vpop.f32.mrb[4].mxu1 }
 0x271   :  { %v708_v55 = vpop.f32.mrb[5].mxu0  ;;  %v779_v56 = vpop.f32.mrb[5].mxu1  ;;  %v707_v9 = vadd.f32 %v706_v53, %v623_v1  ;;  %v778_v11 = vadd.f32 %v777_v54, %v631_v2 }
 0x272   :  { %v709_v57 = vadd.f32 %v708_v55, %v627_v51  ;;  %v780_v58 = vadd.f32 %v779_v56, %v635_v52 }
 0x274   :  { %v784_v59 = vmul.f32 2.0, %v709_v57  ;;  %v789_v60 = vmul.f32 2.0, %v780_v58 }
 0x276   :  { %v785_v61 = vmul.f32 1.442695, %v784_v59  ;;  %v790_v62 = vmul.f32 1.442695, %v789_v60 }
 0x278   :  { %1676 = vpow2.f32 %v785_v61 }
 0x279   :  { %1678 = vpow2.f32 %v790_v62 }
 0x282   :  { %v1677_v7 = vpop.eup %1676 }
 0x283   :  { %v1679_v8 = vpop.eup %1678  ;;  %v787_v10 = vmul.f32 %v1677_v7, %v782_v3 }
 0x284   :  { %v792_v12 = vmul.f32 %v1679_v8, %v783_v4 }
 0x285   :  { %v788_v14 = vadd.f32 %v787_v10, %v707_v9 }
 0x286   :  { %v793_v17 = vadd.f32 %v792_v12, %v778_v11 }
 0x287   :  { %1325 = vmatmul.mubr.f32.vlgmr.msra.gmra.mrb[6].mxu0 %v788_v14  ;;  %1077 = vst [vmem:[#allocation14] sm:$0xff] %v788_v14 }
 0x288   :  { %1360 = vmatmul.mubr.f32.vlgmr.msra.gmra.mrb[6].mxu1 %v793_v17  ;;  %1078 = vst [vmem:[#allocation14 + $0x8] sm:$0xff] %v793_v17  ;;  %1639 = vmatpush3.bf16.msra.mxu0 %v1638_v13 }
 0x289   :  { %1640 = vmatprep.subr.bf16.mxu0 %v1882_v41  ;;  %1394 = vmatprep.mubr.msk.f32.mxu0 %vm1883_vm0, %v1881_v40  ;;  %v1653_v40 = vpack.c.bf16 %v986_v29, %v985_v28 }
 0x28c   :  { %1642 = vmatpush3.bf16.msra.mxu0 %v1641_v18 }
 0x28d   :  { %1643 = vmatprep.subr.bf16.mxu0 %v1882_v41 }
 0x290   :  { %1645 = vmatpush3.bf16.msra.mxu0 %v1644_v21 }
 0x291   :  { %1646 = vmatprep.subr.bf16.mxu0 %v1882_v41 }
 0x294   :  { %1648 = vmatpush3.bf16.msra.mxu0 %v1647_v24 }
 0x295   :  { %1649 = vmatprep.subr.bf16.mxu0 %v1882_v41 }
 0x298   :  { %1651 = vmatpush3.bf16.msra.mxu0 %v1650_v27 }
 0x299   :  { %1652 = vmatprep.subr.bf16.mxu0 %v1882_v41 }
 0x29c   :  { %1654 = vmatpush3.bf16.msra.mxu0 %v1653_v40 }
 0x29d   :  { %1655 = vmatprep.subr.bf16.mxu0 %v1882_v41 }
 0x2a0   :  { %1657 = vmatpush3.bf16.msra.mxu0 %v1656_v32 }
 0x2a1   :  { %1658 = vmatprep.subr.bf16.mxu0 %v1882_v41  ;;  %v1100_v41 = vld [vmem:[%s2121_s10] ss:$0 sm:$0xff] }
 0x2a4   :  { %1660 = vmatpush3.bf16.msra.mxu0 %v1659_v35 }
 0x35a   :  { %v892_v36 = vpop.f32.mrb[6].mxu0 }
 0x35b   :  { %v962_v37 = vpop.f32.mrb[6].mxu1  ;;  %v1326_v39 = vpop.f32.mrb[7].mxu0 }
 0x35c   :  { %v963_v42 = vadd.f32 %v962_v37, %v892_v36  ;;  %v1361_v43 = vpop.f32.mrb[7].mxu1 }
 0x35e   :  { %v973_v44 = vadd.f32 %v1099_v38, %v963_v42 }
 0x360   :  { %v974_v45 = vmax.f32 %v973_v44, 0.0 }
 0x362   :  { %1395 = vmatmul.mubr.f32.vlgmr.msra.gmra.mrb[8].mxu0 %v974_v45 }
 0x435   :  { %v1064_v46 = vpop.f32.mrb[8].mxu0 }
 0x436   :  { %v1065_v47 = vadd.f32 %v1100_v41, %v1064_v46  ;;  %v1396_v48 = vpop.f32.mrb[9].mxu0 }
 0x438   :  { %1068 = vmax.xlane.f32.xlu0 %v1065_v47 }
 0x4c5   :  { %v1069_v49 = vpop.xlane.xlu0 %1068 }
 0x4c6   :  { %v1070_v50 = vsub.f32 %v1065_v47, %v1069_v49 }
 0x4c8   :  { %v1071_v51 = vmul.f32 1.442695, %v1070_v50 }
 0x4ca   :  { %1680 = vpow2.f32 %v1071_v51 }
 0x4d4   :  { %v1681_v52 = vpop.eup %1680 }
 0x4d5   :  { %1073 = vadd.xlane.f32.xlu0 %v1681_v52 }
 0x562   :  { %v1074_v53 = vpop.xlane.xlu0 %1073 }
 0x563   :  { %1682 = vrcp.f32 %v1074_v53 }
 0x56d   :  { %v1683_v54 = vpop.eup %1682 }
 0x56e   :  { %v1076_v55 = vmul.f32 %v1683_v54, %v1681_v52 }
 0x570   :  { %1079 = vst [vmem:[#allocation14 + $0x10] sm:$0xff] %v1076_v55 }
 0x571   :  { %1849 = shalt.err (!%p1846_p4)
}
 0x572   :  { %s1850_s7 = scalar_lea.hbm %s2122_s11, 384 }
 0x573   :  { %p1851_p5 = scmp.ne.s32.totalorder %s2122_s11, %s1850_s7  ;;  %p1854_p6 = scmp.lt.u32.totalorder %s1850_s7, %s2122_s11 }
 0x575   :  { %p1856_p7 = pnand %p1854_p6, %p1851_p5 }
 0x577   :  { %1859 = shalt.err (!%p1856_p7)
}
 0x578   :  { %1089 = dma.vmem_to_hbm [thread:$0]  %s1087_s24, 384, %s2122_s11, [#allocation4]  }
 0x579   :  { %1868 = dma.done.wait [#allocation4], 384  }
 0x57a   :  { %1869 = vsyncadd [#allocation4], 4294966912 }
 0x57b   :  { %1093 = vsyncpa [#allocation3], 1 }
 0x57c   :  { %1094 = vsyncpa [#allocation6], 1 }
 0x57d   :  { %1095 = vsyncpa [#allocation9], 1 }
 0x57e   :  { %1096 = vsyncpa [#allocation12], 1 }
 0x57f   :  { %1097 = vsyncpa [#allocation4], 1 }

</bundles_post_ra>
